<compile_context>
chip_gen: v6e
topology: v6e:2x2x1
jax: 0.10.0
libtpu: 0.0.40
codegen_flags: <defaults>
</compile_context>

<pallas_src>
import functools

import jax
import jax.numpy as jnp
from jax.experimental import pallas as pl
from jax.experimental.pallas import tpu as pltpu


def _round_up(n, m):
    return ((n + m - 1) // m) * m


def _num_tensorcores():
    """Best-effort TensorCore count per chip (v7x has 2, v5e/v6e have 1)."""
    try:
        kind = jax.devices()[0].device_kind.lower()
        return 2 if "v7" in kind else 1
    except Exception:  # pragma: no cover - defensive only
        return 1


def _pick_tm(batch, max_tm=1024):
    """One batch tile per TensorCore, sublane-aligned, VMEM-bounded."""
    per_core = -(-batch // _num_tensorcores())
    return max(8, min(_round_up(per_core, 8), max_tm))


def _make_mlp_kernel(in_size, in_p, hid_p, out_size):
    """Kernel closure over static sizes (slab row offsets are 8-aligned)."""

    def kernel(x_ref, w_ref, b_ref, o_ref):
        # x tile: (tm, in_size).  Weight slab rows: [w1 | w2 | w3], width hid_p.
        x = x_ref[...]
        w1 = w_ref[0:in_size, :]                                  # (in_size, hid_p)
        w2 = w_ref[in_p:in_p + hid_p, :]                          # (hid_p,  hid_p)
        w3 = w_ref[in_p + hid_p:in_p + 2 * hid_p, 0:out_size]     # (hid_p,  out)
        b = b_ref[...]                                            # (8, hid_p)

        h1 = jnp.tanh(
            jnp.dot(x, w1, preferred_element_type=jnp.float32) + b[0:1, :]
        )
        h2 = jnp.tanh(
            jnp.dot(h1, w2, preferred_element_type=jnp.float32) + b[1:2, :]
        )
        o_ref[...] = (
            jnp.dot(h2, w3, preferred_element_type=jnp.float32)
            + b[2:3, 0:out_size]
        ).astype(o_ref.dtype)

    return kernel


def pack_mlp_params(w1, b1, w2, b2, w3, b3):
    """Pack params into one weight slab + one bias slab.  Call ONCE at init.

    Weights are stored (in_features, out_features) so y = x @ W + b (transpose
    of nn.Linear storage; numerically identical to x @ W_pt.T + b).
    Zero-padding is exact: tanh(0)=0 and padded weight rows/cols are zero.
    """
    in_size, hid = w1.shape
    out_size = w3.shape[1]
    in_p = _round_up(max(in_size, 8), 8)              # sublane-aligned fc1 K rows
    hid_p = _round_up(max(hid, out_size, 128), 128)   # lane-dense hidden width

    def pad2(a, rows, cols):
        a = a.astype(jnp.float32)
        return jnp.pad(a, ((0, rows - a.shape[0]), (0, cols - a.shape[1])))

    w_slab = jnp.concatenate(
        [pad2(w1, in_p, hid_p), pad2(w2, hid_p, hid_p), pad2(w3, hid_p, hid_p)],
        axis=0,
    )  # (in_p + 2*hid_p, hid_p)
    b_slab = jnp.concatenate(
        [
            pad2(b1.reshape(1, -1), 1, hid_p),
            pad2(b2.reshape(1, -1), 1, hid_p),
            pad2(b3.reshape(1, -1), 1, hid_p),
            jnp.zeros((5, hid_p), jnp.float32),       # pad to 8 sublanes
        ],
        axis=0,
    )  # (8, hid_p)

    dims = dict(in_size=in_size, in_p=in_p, hid_p=hid_p, out_size=out_size)
    return w_slab, b_slab, dims


@functools.partial(
    jax.jit, static_argnames=("in_size", "in_p", "hid_p", "out_size", "tm")
)
def mlp_forward(x, w_slab, b_slab, *, in_size, in_p, hid_p, out_size, tm):
    """Single pallas_call forward; no wrapper pad/slice passes."""
    batch = x.shape[0]
    tm = min(tm, _round_up(batch, 8))
    grid = (pl.cdiv(batch, tm),)

    kernel = _make_mlp_kernel(in_size, in_p, hid_p, out_size)
    return pl.pallas_call(
        kernel,
        out_shape=jax.ShapeDtypeStruct((batch, out_size), jnp.float32),
        grid=grid,
        in_specs=[
            # x: streamed per batch tile (full feature dim, no host-side pad).
            pl.BlockSpec((tm, in_size), lambda i: (i, 0)),
            # weight / bias slabs: same block every step -> VMEM-resident.
            pl.BlockSpec(w_slab.shape, lambda i: (0, 0)),
            pl.BlockSpec(b_slab.shape, lambda i: (0, 0)),
        ],
        # Full-last-dim output block: (batch, out_size) written directly,
        # no padded lanes, no post-slice.
        out_specs=pl.BlockSpec((tm, out_size), lambda i: (i, 0)),
        compiler_params=pltpu.CompilerParams(
            dimension_semantics=("parallel",),  # shards batch tiles on v7x
        ),
    )(x.astype(jnp.float32), w_slab, b_slab)


def init_linear_params(key, in_features, out_features):
    # Deterministic PyTorch-style init: U(-1/sqrt(fan_in), 1/sqrt(fan_in)).
    kw, kb = jax.random.split(key)
    bound = 1.0 / jnp.sqrt(jnp.float32(in_features))
    w = jax.random.uniform(
        kw, (in_features, out_features), jnp.float32, -bound, bound
    )
    b = jax.random.uniform(kb, (out_features,), jnp.float32, -bound, bound)
    return w, b


if __name__ == "__main__":
    # Shapes implied by the module: control vector of size 5, hidden 32,
    # latent (output) size 16.  Batch 512 exercises the batch grid.
    batch, input_size, hidden_size, output_size = 512, 5, 32, 16

    key = jax.random.PRNGKey(0)
    kx, k1, k2, k3 = jax.random.split(key, 4)

    x = jax.random.normal(kx, (batch, input_size), jnp.float32)
    w1, b1 = init_linear_params(k1, input_size, hidden_size)
    w2, b2 = init_linear_params(k2, hidden_size, hidden_size)
    w3, b3 = init_linear_params(k3, hidden_size, output_size)

    # ---- init-time packing (done once, outside the per-call path) ----
    w_slab, b_slab, dims = pack_mlp_params(w1, b1, w2, b2, w3, b3)
    w_slab = jax.block_until_ready(w_slab)
    b_slab = jax.block_until_ready(b_slab)
    tm = _pick_tm(batch)  # v5e/v6e: 512 (1 step); v7x: 256 (1 tile per TC)

    # ---- forward ----
    out = mlp_forward(x, w_slab, b_slab, tm=tm, **dims)
    out = jax.block_until_ready(out)

    # Pure-JAX reference (same semantics as the PyTorch forward).
    ref = jnp.tanh(x @ w1 + b1[None, :])
    ref = jnp.tanh(ref @ w2 + b2[None, :])
    ref = ref @ w3 + b3[None, :]

    assert out.shape == (batch, output_size), out.shape
    max_err = float(jnp.max(jnp.abs(out - ref)))
    assert jnp.allclose(out, ref, atol=1e-4, rtol=1e-4), max_err

    print("KERNEL_OK")
</pallas_src>

<mosaic_0001>
module attributes {stable_mosaic.version = 11 : i64} {
  func.func @kernel(%arg0: i32, %arg1: memref<512x5xf32, #tpu.memory_space<vmem>>, %arg2: memref<264x128xf32, #tpu.memory_space<vmem>>, %arg3: memref<8x128xf32, #tpu.memory_space<vmem>>, %arg4: memref<512x16xf32, #tpu.memory_space<vmem>>) attributes {dimension_semantics = [#tpu.dimension_semantics<parallel>], iteration_bounds = array<i64: 1>, scalar_prefetch = 0 : i64, scratch_operands = 0 : i64, tpu.core_type = #tpu.core_type<tc>, window_params = [{transform_indices = @transform_0, window_bounds = array<i64: 512, 5>}, {pipeline_mode = #tpu.pipeline_mode<synchronous>, transform_indices = @transform_1, window_bounds = array<i64: 264, 128>}, {pipeline_mode = #tpu.pipeline_mode<synchronous>, transform_indices = @transform_2, window_bounds = array<i64: 8, 128>}, {transform_indices = @transform_3, window_bounds = array<i64: 512, 16>}]} {
    %c0 = arith.constant 0 : index
    %c0_0 = arith.constant 0 : index
    %0 = vector.load %arg1[%c0, %c0_0] : memref<512x5xf32, #tpu.memory_space<vmem>>, vector<512x5xf32>
    %c0_1 = arith.constant 0 : index
    %c0_2 = arith.constant 0 : index
    %1 = vector.load %arg2[%c0_1, %c0_2] : memref<264x128xf32, #tpu.memory_space<vmem>>, vector<5x128xf32>
    %c8 = arith.constant 8 : index
    %c0_3 = arith.constant 0 : index
    %2 = vector.load %arg2[%c8, %c0_3] : memref<264x128xf32, #tpu.memory_space<vmem>>, vector<128x128xf32>
    %c136 = arith.constant 136 : index
    %c0_4 = arith.constant 0 : index
    %3 = vector.load %arg2[%c136, %c0_4] : memref<264x128xf32, #tpu.memory_space<vmem>>, vector<128x16xf32>
    %c0_5 = arith.constant 0 : index
    %c0_6 = arith.constant 0 : index
    %4 = vector.load %arg3[%c0_5, %c0_6] : memref<8x128xf32, #tpu.memory_space<vmem>>, vector<8x128xf32>
    %cst = arith.constant dense<0.000000e+00> : vector<512x128xf32>
    %5 = tpu.matmul %0, %1, %cst {dimension_numbers = #tpu.dot_dimension_numbers<[1], [0], [0], [1], [0, 0, 1, 1], [], []>} : vector<512x5xf32>, vector<5x128xf32>, vector<512x128xf32> -> vector<512x128xf32>
    %6 = vector.extract_strided_slice %4 {offsets = [0, 0], sizes = [1, 128], strides = [1, 1]} : vector<8x128xf32> to vector<1x128xf32>
    %7 = vector.broadcast %6 : vector<1x128xf32> to vector<512x128xf32>
    %8 = arith.addf %5, %7 : vector<512x128xf32>
    %9 = math.tanh %8 : vector<512x128xf32>
    %cst_7 = arith.constant dense<0.000000e+00> : vector<512x128xf32>
    %10 = tpu.matmul %9, %2, %cst_7 {dimension_numbers = #tpu.dot_dimension_numbers<[1], [0], [0], [1], [0, 0, 1, 1], [], []>} : vector<512x128xf32>, vector<128x128xf32>, vector<512x128xf32> -> vector<512x128xf32>
    %11 = vector.extract_strided_slice %4 {offsets = [1, 0], sizes = [1, 128], strides = [1, 1]} : vector<8x128xf32> to vector<1x128xf32>
    %12 = vector.broadcast %11 : vector<1x128xf32> to vector<512x128xf32>
    %13 = arith.addf %10, %12 : vector<512x128xf32>
    %14 = math.tanh %13 : vector<512x128xf32>
    %cst_8 = arith.constant dense<0.000000e+00> : vector<512x16xf32>
    %15 = tpu.matmul %14, %3, %cst_8 {dimension_numbers = #tpu.dot_dimension_numbers<[1], [0], [0], [1], [0, 0, 1, 1], [], []>} : vector<512x128xf32>, vector<128x16xf32>, vector<512x16xf32> -> vector<512x16xf32>
    %16 = vector.extract_strided_slice %4 {offsets = [2, 0], sizes = [1, 16], strides = [1, 1]} : vector<8x128xf32> to vector<1x16xf32>
    %17 = vector.broadcast %16 : vector<1x16xf32> to vector<512x16xf32>
    %18 = arith.addf %15, %17 : vector<512x16xf32>
    %c0_9 = arith.constant 0 : index
    %c0_10 = arith.constant 0 : index
    %19 = vector.load %arg4[%c0_9, %c0_10] : memref<512x16xf32, #tpu.memory_space<vmem>>, vector<512x16xf32>
    tpu.vector_store %arg4[%c0_9, %c0_10], %18 {strides = array<i32>} : memref<512x16xf32, #tpu.memory_space<vmem>>, vector<512x16xf32>,
    return
  }
  func.func @transform_0(%arg0: i32) -> (i32, i32) {
    %c0_i32 = arith.constant 0 : i32
    %c0_i32_0 = arith.constant 0 : i32
    return %arg0, %c0_i32 : i32, i32
  }
  func.func @transform_1(%arg0: i32) -> (i32, i32) {
    %c0_i32 = arith.constant 0 : i32
    %c0_i32_0 = arith.constant 0 : i32
    %c0_i32_1 = arith.constant 0 : i32
    return %c0_i32, %c0_i32_0 : i32, i32
  }
  func.func @transform_2(%arg0: i32) -> (i32, i32) {
    %c0_i32 = arith.constant 0 : i32
    %c0_i32_0 = arith.constant 0 : i32
    %c0_i32_1 = arith.constant 0 : i32
    return %c0_i32, %c0_i32_0 : i32, i32
  }
  func.func @transform_3(%arg0: i32) -> (i32, i32) {
    %c0_i32 = arith.constant 0 : i32
    %c0_i32_0 = arith.constant 0 : i32
    return %arg0, %c0_i32 : i32, i32
  }
}

</mosaic_0001>

<bundles_post_ra>
// kernel: mlp_forward.1
= control target key start
LH: loop header
LB: loop body
LE: loop exit
PB: predicated region body
PF: predicated region fallthrough
CT: control target
= control target key end

     0   :  { %vm309_vm0 = vcmask 1044480   ;;  %vm116_vm1 = vcmask 39936   ;;  %vm1604_vm2 = vcmask 130048   ;;  %s3489_s1 = inlined_call_operand.vmem [shape: f32[264,128], index: 1, kind: input, shape index: {}]   ;;  %s3490_s0 = inlined_call_operand.vmem [shape: f32[512,5], index: 0, kind: input, shape index: {}]   ;;  %s3491_s2 = inlined_call_operand.vmem [shape: f32[8,128], index: 2, kind: input, shape index: {}]   ;;  %s3492_s3 = inlined_call_operand.vmem [shape: f32[512,16], index: 3, kind: output, shape index: {}]  }
   0x1   :  { %v78_v0 = vld [vmem:[%s3489_s1] sm:$0x1f]  ;;  %v15_v2 = vld [vmem:[%s3490_s0 + $0x8] sm:$0xff]  ;;  %v16_v3 = vld [vmem:[%s3490_s0 + $0x10] sm:$0xff] }
   0x2   :  { %v14_v1 = vld [vmem:[%s3490_s0] sm:$0xff]  ;;  %1963 = vmatprep.subr.msk.mxu0 %vm309_vm0, %v78_v0  ;;  %2317 = vmatprep.subr.msk.mxu1 %vm309_vm0, %v78_v0  ;;  %v17_v4 = vld [vmem:[%s3490_s0 + $0x18] sm:$0xff]  ;;  %v19_v6 = vld [vmem:[%s3490_s0 + $0x28] sm:$0xff] }
   0x3   :  { %1965 = vmatprep.mubr.msk.f32.mxu0 %vm116_vm1, %v14_v1  ;;  %1964 = vmatpush3.msk.msra.mxu0 %vm309_vm0, %v78_v0  ;;  %v18_v5 = vld [vmem:[%s3490_s0 + $0x20] sm:$0xff]  ;;  %v20_v7 = vld [vmem:[%s3490_s0 + $0x30] sm:$0xff]  ;;  %v47_v9 = vld [vmem:[%s3490_s0 + $0x108] sm:$0xff] }
   0x4   :  { %1966 = vmatmul.mubr.msk.f32.vlgmr.msra.gmra.mxu0 %vm116_vm1, %v15_v2  ;;  %2318 = vmatpush3.msk.msra.mxu1 %vm309_vm0, %v78_v0  ;;  %v46_v8 = vld [vmem:[%s3490_s0 + $0x100] sm:$0xff]  ;;  %v48_v10 = vld [vmem:[%s3490_s0 + $0x110] sm:$0xff]  ;;  %v21_v11 = vld [vmem:[%s3490_s0 + $0x38] sm:$0xff] }
   0x5   :  { %1968 = vmatprep.mubr.msk.f32.mxu0 %vm116_vm1, %v16_v3  ;;  %2013 = vmatprep.mubr.msk.f32.mxu1 %vm116_vm1, %v46_v8  ;;  %v22_v12 = vld [vmem:[%s3490_s0 + $0x40] sm:$0xff]  ;;  %v49_v13 = vld [vmem:[%s3490_s0 + $0x118] sm:$0xff]  ;;  %v23_v15 = vld [vmem:[%s3490_s0 + $0x48] sm:$0xff] }
   0x6   :  { %2014 = vmatmul.mubr.msk.f32.vlgmr.msra.gmra.mxu1 %vm116_vm1, %v47_v9  ;;  %v50_v14 = vld [vmem:[%s3490_s0 + $0x120] sm:$0xff]  ;;  %v24_v16 = vld [vmem:[%s3490_s0 + $0x50] sm:$0xff]  ;;  %v51_v17 = vld [vmem:[%s3490_s0 + $0x128] sm:$0xff] }
   0x7   :  { %2016 = vmatprep.mubr.msk.f32.mxu1 %vm116_vm1, %v48_v10  ;;  %v52_v18 = vld [vmem:[%s3490_s0 + $0x130] sm:$0xff]  ;;  %v25_v19 = vld [vmem:[%s3490_s0 + $0x58] sm:$0xff]  ;;  %v26_v20 = vld [vmem:[%s3490_s0 + $0x60] sm:$0xff] }
   0x8   :  { %1969 = vmatmul.mubr.msk.f32.gmra.mxu0 %vm116_vm1, %v17_v4  ;;  %v94_v21 = vld [vmem:[%s3489_s1 + $0x80] sm:$0xff]  ;;  %v53_v22 = vld [vmem:[%s3490_s0 + $0x138] sm:$0xff]  ;;  %v27_v25 = vld [vmem:[%s3490_s0 + $0x68] sm:$0xff] }
   0x9   :  { %1971 = vmatprep.mubr.msk.f32.mxu0 %vm116_vm1, %v18_v5  ;;  %2061 = vmatprep.subr.mxu1 %v94_v21  ;;  %v93_v23 = vld [vmem:[%s3489_s1 + $0x78] sm:$0xff]  ;;  %v54_v24 = vld [vmem:[%s3490_s0 + $0x140] sm:$0xff]  ;;  %v92_v26 = vld [vmem:[%s3489_s1 + $0x70] sm:$0xff] }
   0xa   :  { %2017 = vmatmul.mubr.msk.f32.gmra.mxu1 %vm116_vm1, %v49_v13  ;;  %v28_v27 = vld [vmem:[%s3490_s0 + $0x70] sm:$0xff]  ;;  %v55_v28 = vld [vmem:[%s3490_s0 + $0x148] sm:$0xff]  ;;  %v29_v31 = vld [vmem:[%s3490_s0 + $0x78] sm:$0xff] }
   0xb   :  { %2019 = vmatprep.mubr.msk.f32.mxu1 %vm116_vm1, %v50_v14  ;;  %2062 = vmatpush3.msra.mxu1 %v94_v21  ;;  %v91_v29 = vld [vmem:[%s3489_s1 + $0x68] sm:$0xff]  ;;  %v56_v30 = vld [vmem:[%s3490_s0 + $0x150] sm:$0xff]  ;;  %v90_v32 = vld [vmem:[%s3489_s1 + $0x60] sm:$0xff] }
   0xc   :  { %1972 = vmatmul.mubr.msk.f32.gmra.mxu0 %vm116_vm1, %v19_v6  ;;  %2063 = vmatprep.subr.mxu1 %v93_v23  ;;  %v30_v33 = vld [vmem:[%s3490_s0 + $0x80] sm:$0xff]  ;;  %v57_v34 = vld [vmem:[%s3490_s0 + $0x158] sm:$0xff]  ;;  %v31_v37 = vld [vmem:[%s3490_s0 + $0x88] sm:$0xff] }
   0xd   :  { %1974 = vmatprep.mubr.msk.f32.mxu0 %vm116_vm1, %v20_v7  ;;  %2064 = vmatpush3.msra.mxu1 %v93_v23  ;;  %v89_v35 = vld [vmem:[%s3489_s1 + $0x58] sm:$0xff]  ;;  %v58_v36 = vld [vmem:[%s3490_s0 + $0x160] sm:$0xff]  ;;  %v88_v38 = vld [vmem:[%s3489_s1 + $0x50] sm:$0xff] }
   0xe   :  { %2020 = vmatmul.mubr.msk.f32.gmra.mxu1 %vm116_vm1, %v51_v17  ;;  %2065 = vmatprep.subr.mxu1 %v92_v26  ;;  %v32_v39 = vld [vmem:[%s3490_s0 + $0x90] sm:$0xff]  ;;  %v59_v40 = vld [vmem:[%s3490_s0 + $0x168] sm:$0xff]  ;;  %v33_v43 = vld [vmem:[%s3490_s0 + $0x98] sm:$0xff]  ;;  %v112_v17 = vlaneseq }
   0xf   :  { %2022 = vmatprep.mubr.msk.f32.mxu1 %vm116_vm1, %v52_v18  ;;  %2066 = vmatpush3.msra.mxu1 %v92_v26  ;;  %v87_v41 = vld [vmem:[%s3489_s1 + $0x48] sm:$0xff]  ;;  %v60_v42 = vld [vmem:[%s3490_s0 + $0x170] sm:$0xff]  ;;  %v86_v44 = vld [vmem:[%s3489_s1 + $0x40] sm:$0xff] }
  0x10   :  { %1975 = vmatmul.mubr.msk.f32.gmra.mxu0 %vm116_vm1, %v21_v11  ;;  %2067 = vmatprep.subr.mxu1 %v91_v29  ;;  %v34_v45 = vld [vmem:[%s3490_s0 + $0xa0] sm:$0xff]  ;;  %v61_v46 = vld [vmem:[%s3490_s0 + $0x178] sm:$0xff]  ;;  %v35_v49 = vld [vmem:[%s3490_s0 + $0xa8] sm:$0xff]  ;;  %v2903_v18 = vshrl.u32 %v112_v17, 7 }
  0x11   :  { %1977 = vmatprep.mubr.msk.f32.mxu0 %vm116_vm1, %v22_v12  ;;  %2068 = vmatpush3.msra.mxu1 %v91_v29  ;;  %v85_v47 = vld [vmem:[%s3489_s1 + $0x38] sm:$0xff]  ;;  %v62_v48 = vld [vmem:[%s3490_s0 + $0x180] sm:$0xff]  ;;  %v84_v50 = vld [vmem:[%s3489_s1 + $0x30] sm:$0xff] }
  0x12   :  { %2023 = vmatmul.mubr.msk.f32.gmra.mxu1 %vm116_vm1, %v53_v22  ;;  %2069 = vmatprep.subr.mxu1 %v90_v32  ;;  %v36_v51 = vld [vmem:[%s3490_s0 + $0xb0] sm:$0xff]  ;;  %v63_v52 = vld [vmem:[%s3490_s0 + $0x188] sm:$0xff]  ;;  %v37_v55 = vld [vmem:[%s3490_s0 + $0xb8] sm:$0xff] }
  0x13   :  { %2025 = vmatprep.mubr.msk.f32.mxu1 %vm116_vm1, %v54_v24  ;;  %2070 = vmatpush3.msra.mxu1 %v90_v32  ;;  %v83_v53 = vld [vmem:[%s3489_s1 + $0x28] sm:$0xff]  ;;  %v64_v54 = vld [vmem:[%s3490_s0 + $0x190] sm:$0xff]  ;;  %v38_v56 = vld [vmem:[%s3490_s0 + $0xc0] sm:$0xff] }
  0x14   :  { %1978 = vmatmul.mubr.msk.f32.gmra.mxu0 %vm116_vm1, %v23_v15  ;;  %2071 = vmatprep.subr.mxu1 %v89_v35  ;;  %v65_v57 = vld [vmem:[%s3490_s0 + $0x198] sm:$0xff]  ;;  %v66_v58 = vld [vmem:[%s3490_s0 + $0x1a0] sm:$0xff]  ;;  %v39_v59 = vld [vmem:[%s3490_s0 + $0xc8] sm:$0xff] }
  0x15   :  { %1980 = vmatprep.mubr.msk.f32.mxu0 %vm116_vm1, %v24_v16  ;;  %2072 = vmatpush3.msra.mxu1 %v89_v35  ;;  %v40_v60 = vld [vmem:[%s3490_s0 + $0xd0] sm:$0xff]  ;;  %v67_v61 = vld [vmem:[%s3490_s0 + $0x1a8] sm:$0xff]  ;;  %v41_v63 = vld [vmem:[%s3490_s0 + $0xd8] sm:$0xff] }
  0x16   :  { %2026 = vmatmul.mubr.msk.f32.gmra.mxu1 %vm116_vm1, %v55_v28  ;;  %2073 = vmatprep.subr.mxu1 %v88_v38  ;;  %v68_v62 = vld [vmem:[%s3490_s0 + $0x1b0] sm:$0xff]  ;;  %v42_v0 = vld [vmem:[%s3490_s0 + $0xe0] sm:$0xff]  ;;  %v69_v1 = vld [vmem:[%s3490_s0 + $0x1b8] sm:$0xff] }
  0x17   :  { %2028 = vmatprep.mubr.msk.f32.mxu1 %vm116_vm1, %v56_v30  ;;  %2074 = vmatpush3.msra.mxu1 %v88_v38  ;;  %v70_v2 = vld [vmem:[%s3490_s0 + $0x1c0] sm:$0xff]  ;;  %v43_v3 = vld [vmem:[%s3490_s0 + $0xe8] sm:$0xff]  ;;  %v44_v4 = vld [vmem:[%s3490_s0 + $0xf0] sm:$0xff] }
  0x18   :  { %1981 = vmatmul.mubr.msk.f32.gmra.mxu0 %vm116_vm1, %v25_v19  ;;  %2075 = vmatprep.subr.mxu1 %v87_v41  ;;  %v71_v5 = vld [vmem:[%s3490_s0 + $0x1c8] sm:$0xff]  ;;  %v72_v6 = vld [vmem:[%s3490_s0 + $0x1d0] sm:$0xff]  ;;  %v45_v7 = vld [vmem:[%s3490_s0 + $0xf8] sm:$0xff]  ;;  %v114_v19 = vsub.s32 0, %v2903_v18 }
  0x19   :  { %1983 = vmatprep.mubr.msk.f32.mxu0 %vm116_vm1, %v26_v20  ;;  %2076 = vmatpush3.msra.mxu1 %v87_v41  ;;  %v73_v8 = vld [vmem:[%s3490_s0 + $0x1d8] sm:$0xff]  ;;  %v74_v9 = vld [vmem:[%s3490_s0 + $0x1e0] sm:$0xff]  ;;  %v75_v10 = vld [vmem:[%s3490_s0 + $0x1e8] sm:$0xff] }
  0x1a   :  { %2029 = vmatmul.mubr.msk.f32.gmra.mxu1 %vm116_vm1, %v57_v34  ;;  %2077 = vmatprep.subr.mxu1 %v86_v44  ;;  %v76_v11 = vld [vmem:[%s3490_s0 + $0x1f0] sm:$0xff]  ;;  %v77_v12 = vld [vmem:[%s3490_s0 + $0x1f8] sm:$0xff]  ;;  %v82_v13 = vld [vmem:[%s3489_s1 + $0x20] sm:$0xff] }
  0x1b   :  { %2031 = vmatprep.mubr.msk.f32.mxu1 %vm116_vm1, %v58_v36  ;;  %2078 = vmatpush3.msra.mxu1 %v86_v44  ;;  %v81_v14 = vld [vmem:[%s3489_s1 + $0x18] sm:$0xff]  ;;  %v80_v15 = vld [vmem:[%s3489_s1 + $0x10] sm:$0xff]  ;;  %v79_v16 = vld [vmem:[%s3489_s1 + $0x8] sm:$0xff] }
  0x1c   :  { %1984 = vmatmul.mubr.msk.f32.gmra.mxu0 %vm116_vm1, %v27_v25  ;;  %2079 = vmatprep.subr.mxu1 %v85_v47  ;;  %v2909_v20 = vld [vmem:[%s3491_s2] sm:$0xff]  ;;  %v109_v44 = vld [vmem:[%s3489_s1 + $0xf8] sm:$0xff] }
  0x1d   :  { %1986 = vmatprep.mubr.msk.f32.mxu0 %vm116_vm1, %v28_v27  ;;  %2080 = vmatpush3.msra.mxu1 %v85_v47  ;;  %v2912_v21 = vrot.slane %v2909_v20, %v114_v19  ;;  %v101_v19 = vld [vmem:[%s3489_s1 + $0xb8] sm:$0xff] }
  0x1e   :  { %2032 = vmatmul.mubr.msk.f32.gmra.mxu1 %vm116_vm1, %v59_v40  ;;  %2081 = vmatprep.subr.mxu1 %v84_v50 }
  0x1f   :  { %2034 = vmatprep.mubr.msk.f32.mxu1 %vm116_vm1, %v60_v42  ;;  %2082 = vmatpush3.msra.mxu1 %v84_v50 }
  0x20   :  { %1987 = vmatmul.mubr.msk.f32.gmra.mxu0 %vm116_vm1, %v29_v31  ;;  %2083 = vmatprep.subr.mxu1 %v83_v53 }
  0x21   :  { %1989 = vmatprep.mubr.msk.f32.mxu0 %vm116_vm1, %v30_v33  ;;  %2084 = vmatpush3.msra.mxu1 %v83_v53 }
  0x22   :  { %2035 = vmatmul.mubr.msk.f32.gmra.mxu1 %vm116_vm1, %v61_v46  ;;  %2085 = vmatprep.subr.mxu1 %v82_v13 }
  0x23   :  { %2037 = vmatprep.mubr.msk.f32.mxu1 %vm116_vm1, %v62_v48  ;;  %2086 = vmatpush3.msra.mxu1 %v82_v13 }
  0x24   :  { %1990 = vmatmul.mubr.msk.f32.gmra.mxu0 %vm116_vm1, %v31_v37  ;;  %2087 = vmatprep.subr.mxu1 %v81_v14 }
  0x25   :  { %1992 = vmatprep.mubr.msk.f32.mxu0 %vm116_vm1, %v32_v39  ;;  %2088 = vmatpush3.msra.mxu1 %v81_v14  ;;  %v102_v14 = vld [vmem:[%s3489_s1 + $0xc0] sm:$0xff] }
  0x26   :  { %2038 = vmatmul.mubr.msk.f32.gmra.mxu1 %vm116_vm1, %v63_v52  ;;  %2089 = vmatprep.subr.mxu1 %v80_v15 }
  0x27   :  { %2040 = vmatprep.mubr.msk.f32.mxu1 %vm116_vm1, %v64_v54  ;;  %2090 = vmatpush3.msra.mxu1 %v80_v15  ;;  %v107_v54 = vld [vmem:[%s3489_s1 + $0xe8] sm:$0xff] }
  0x28   :  { %1993 = vmatmul.mubr.msk.f32.gmra.mxu0 %vm116_vm1, %v33_v43  ;;  %2091 = vmatprep.subr.mxu1 %v79_v16  ;;  %v110_v43 = vld [vmem:[%s3489_s1 + $0x100] sm:$0xff] }
  0x29   :  { %1995 = vmatprep.mubr.msk.f32.mxu0 %vm116_vm1, %v34_v45  ;;  %2092 = vmatpush3.msra.mxu1 %v79_v16 }
  0x2a   :  { %2041 = vmatmul.mubr.msk.f32.gmra.mxu1 %vm116_vm1, %v65_v57  ;;  %2189 = vmatprep.subr.mxu0 %v110_v43 }
  0x2b   :  { %2043 = vmatprep.mubr.msk.f32.mxu1 %vm116_vm1, %v66_v58  ;;  %2190 = vmatpush3.msra.mxu0 %v110_v43 }
  0x2c   :  { %1996 = vmatmul.mubr.msk.f32.gmra.mxu0 %vm116_vm1, %v35_v49  ;;  %v108_v49 = vld [vmem:[%s3489_s1 + $0xf0] sm:$0xff]  ;;  %2191 = vmatprep.subr.mxu0 %v109_v44 }
  0x2d   :  { %1998 = vmatprep.mubr.msk.f32.mxu0 %vm116_vm1, %v36_v51  ;;  %2192 = vmatpush3.msra.mxu0 %v109_v44 }
  0x2e   :  { %2044 = vmatmul.mubr.msk.f32.gmra.mxu1 %vm116_vm1, %v67_v61  ;;  %2193 = vmatprep.subr.mxu0 %v108_v49 }
  0x2f   :  { %2046 = vmatprep.mubr.msk.f32.mxu1 %vm116_vm1, %v68_v62  ;;  %2194 = vmatpush3.msra.mxu0 %v108_v49 }
  0x30   :  { %1999 = vmatmul.mubr.msk.f32.gmra.mxu0 %vm116_vm1, %v37_v55  ;;  %2195 = vmatprep.subr.mxu0 %v107_v54 }
  0x31   :  { %2001 = vmatprep.mubr.msk.f32.mxu0 %vm116_vm1, %v38_v56  ;;  %2196 = vmatpush3.msra.mxu0 %v107_v54 }
  0x32   :  { %2047 = vmatmul.mubr.msk.f32.gmra.mxu1 %vm116_vm1, %v69_v1 }
  0x33   :  { %2049 = vmatprep.mubr.msk.f32.mxu1 %vm116_vm1, %v70_v2 }
  0x34   :  { %2002 = vmatmul.mubr.msk.f32.gmra.mxu0 %vm116_vm1, %v39_v59  ;;  %v106_v59 = vld [vmem:[%s3489_s1 + $0xe0] sm:$0xff] }
  0x35   :  { %2004 = vmatprep.mubr.msk.f32.mxu0 %vm116_vm1, %v40_v60  ;;  %2197 = vmatprep.subr.mxu0 %v106_v59 }
  0x36   :  { %2050 = vmatmul.mubr.msk.f32.gmra.mxu1 %vm116_vm1, %v71_v5  ;;  %2198 = vmatpush3.msra.mxu0 %v106_v59  ;;  %v104_v5 = vld [vmem:[%s3489_s1 + $0xd0] sm:$0xff] }
  0x37   :  { %2052 = vmatprep.mubr.msk.f32.mxu1 %vm116_vm1, %v72_v6 }
  0x38   :  { %2005 = vmatmul.mubr.msk.f32.gmra.mxu0 %vm116_vm1, %v41_v63 }
  0x39   :  { %2007 = vmatprep.mubr.msk.f32.mxu0 %vm116_vm1, %v42_v0  ;;  %v105_v0 = vld [vmem:[%s3489_s1 + $0xd8] sm:$0xff] }
  0x3a   :  { %2053 = vmatmul.mubr.msk.f32.gmra.mxu1 %vm116_vm1, %v73_v8  ;;  %2199 = vmatprep.subr.mxu0 %v105_v0 }
  0x3b   :  { %2055 = vmatprep.mubr.msk.f32.mxu1 %vm116_vm1, %v74_v9  ;;  %2200 = vmatpush3.msra.mxu0 %v105_v0  ;;  %v103_v9 = vld [vmem:[%s3489_s1 + $0xc8] sm:$0xff] }
  0x3c   :  { %2008 = vmatmul.mubr.msk.f32.gmra.mxu0 %vm116_vm1, %v43_v3  ;;  %2201 = vmatprep.subr.mxu0 %v104_v5 }
  0x3d   :  { %2010 = vmatprep.mubr.msk.f32.mxu0 %vm116_vm1, %v44_v4  ;;  %2202 = vmatpush3.msra.mxu0 %v104_v5 }
  0x3e   :  { %2056 = vmatmul.mubr.msk.f32.gmra.mxu1 %vm116_vm1, %v75_v10  ;;  %2203 = vmatprep.subr.mxu0 %v103_v9 }
  0x3f   :  { %2058 = vmatprep.mubr.msk.f32.mxu1 %vm116_vm1, %v76_v11  ;;  %2204 = vmatpush3.msra.mxu0 %v103_v9 }
  0x40   :  { %2011 = vmatmul.mubr.msk.f32.gmra.mxu0 %vm116_vm1, %v45_v7  ;;  %2205 = vmatprep.subr.mxu0 %v102_v14 }
  0x41   :  { %2206 = vmatpush3.msra.mxu0 %v102_v14 }
  0x42   :  { %2059 = vmatmul.mubr.msk.f32.gmra.mxu1 %vm116_vm1, %v77_v12  ;;  %2207 = vmatprep.subr.mxu0 %v101_v19 }
  0x43   :  { %2208 = vmatpush3.msra.mxu0 %v101_v19 }
  0xc4   :  { %v1967_v22 = vpop.f32.mrf.mxu0 }
  0xc5   :  { %v385_v23 = vadd.f32 %v1967_v22, %v2912_v21 }
  0xc6   :  { %v379_v24 = vpop.f32.mrf.mxu0  ;;  %v2919_v33 = vpop.f32.mrf.mxu1 }
  0xc7   :  { %v380_v25 = vadd.f32 %v379_v24, %v2912_v21 }
  0xc8   :  { %v1970_v26 = vpop.f32.mrf.mxu0  ;;  %v2922_v36 = vpop.f32.mrf.mxu1 }
  0xc9   :  { %2319 = vtanh.f32 %v380_v25  ;;  %v395_v27 = vadd.f32 %v1970_v26, %v2912_v21  ;;  %v100_v26 = vld [vmem:[%s3489_s1 + $0xb0] sm:$0xff] }
  0xca   :  { %2321 = vtanh.f32 %v385_v23  ;;  %v389_v28 = vpop.f32.mrf.mxu0  ;;  %v2925_v39 = vpop.f32.mrf.mxu1  ;;  %2209 = vmatprep.subr.mxu0 %v100_v26 }
  0xcb   :  { %v390_v29 = vadd.f32 %v389_v28, %v2912_v21  ;;  %2210 = vmatpush3.msra.mxu0 %v100_v26 }
  0xcc   :  { %v1973_v30 = vpop.f32.mrf.mxu0  ;;  %v2928_v42 = vpop.f32.mrf.mxu1 }
  0xcd   :  { %2323 = vtanh.f32 %v390_v29  ;;  %v405_v31 = vadd.f32 %v1973_v30, %v2912_v21  ;;  %v99_v30 = vld [vmem:[%s3489_s1 + $0xa8] sm:$0xff] }
  0xce   :  { %2325 = vtanh.f32 %v395_v27  ;;  %v399_v32 = vpop.f32.mrf.mxu0  ;;  %v2937_v48 = vpop.f32.mrf.mxu1  ;;  %2211 = vmatprep.subr.mxu0 %v99_v30 }
  0xcf   :  { %v400_v34 = vadd.f32 %v399_v32, %v2912_v21  ;;  %2212 = vmatpush3.msra.mxu0 %v99_v30  ;;  %v550_v30 = vadd.f32 %v2928_v42, %v2912_v21 }
  0xd0   :  { %v1976_v35 = vpop.f32.mrf.mxu0  ;;  %v2943_v53 = vpop.f32.mrf.mxu1 }
  0xd1   :  { %2327 = vtanh.f32 %v400_v34  ;;  %v415_v37 = vadd.f32 %v1976_v35, %v2912_v21 }
  0xd2   :  { %2329 = vtanh.f32 %v405_v31  ;;  %v409_v38 = vpop.f32.mrf.mxu0  ;;  %v2949_v58 = vpop.f32.mrf.mxu1 }
  0xd3   :  { %v410_v40 = vadd.f32 %v409_v38, %v2912_v21 }
  0xd4   :  { %v1979_v41 = vpop.f32.mrf.mxu0  ;;  %v2955_v63 = vpop.f32.mrf.mxu1 }
  0xd5   :  { %2331 = vtanh.f32 %v410_v40  ;;  %v425_v46 = vadd.f32 %v1979_v41, %v2912_v21 }
  0xd6   :  { %v2320_v45 = vpop.eup %2319  ;;  %2333 = vtanh.f32 %v415_v37  ;;  %v419_v47 = vpop.f32.mrf.mxu0 }
  0xd7   :  { %v2322_v50 = vpop.eup %2321  ;;  %v420_v51 = vadd.f32 %v419_v47, %v2912_v21  ;;  %2093 = vmatprep.mubr.f32.mxu1 %v2320_v45  ;;  %v2961_v4 = vpop.f32.mrf.mxu1 }
  0xd8   :  { %v1982_v52 = vpop.f32.mrf.mxu0  ;;  %2094 = vmatmul.mubr.f32.vlgmr.msra.gmra.mxu1 %v2322_v50 }
  0xd9   :  { %2335 = vtanh.f32 %v420_v51  ;;  %v435_v56 = vadd.f32 %v1982_v52, %v2912_v21  ;;  %v2971_v13 = vpop.f32.mrf.mxu1 }
  0xda   :  { %v2324_v55 = vpop.eup %2323  ;;  %2337 = vtanh.f32 %v425_v46  ;;  %v429_v57 = vpop.f32.mrf.mxu0 }
  0xdb   :  { %v2326_v60 = vpop.eup %2325  ;;  %v430_v61 = vadd.f32 %v429_v57, %v2912_v21  ;;  %2096 = vmatprep.mubr.f32.mxu1 %v2324_v55  ;;  %v2981_v25 = vpop.f32.mrf.mxu1 }
  0xdc   :  { %v1985_v62 = vpop.f32.mrf.mxu0  ;;  %2097 = vmatmul.mubr.f32.gmra.mxu1 %v2326_v60 }
  0xdd   :  { %2339 = vtanh.f32 %v430_v61  ;;  %v445_v2 = vadd.f32 %v1985_v62, %v2912_v21  ;;  %v2991_v35 = vpop.f32.mrf.mxu1 }
  0xde   :  { %v2328_v1 = vpop.eup %2327  ;;  %2341 = vtanh.f32 %v435_v56  ;;  %v439_v3 = vpop.f32.mrf.mxu0 }
  0xdf   :  { %v2330_v6 = vpop.eup %2329  ;;  %v440_v7 = vadd.f32 %v439_v3, %v2912_v21  ;;  %2099 = vmatprep.mubr.f32.mxu1 %v2328_v1  ;;  %v2995_v45 = vpop.f32.mrf.mxu1 }
  0xe0   :  { %v1988_v8 = vpop.f32.mrf.mxu0  ;;  %2100 = vmatmul.mubr.f32.gmra.mxu1 %v2330_v6 }
  0xe1   :  { %2343 = vtanh.f32 %v440_v7  ;;  %v455_v11 = vadd.f32 %v1988_v8, %v2912_v21  ;;  %v2999_v54 = vpop.f32.mrf.mxu1 }
  0xe2   :  { %v2332_v10 = vpop.eup %2331  ;;  %2345 = vtanh.f32 %v445_v2  ;;  %v449_v12 = vpop.f32.mrf.mxu0 }
  0xe3   :  { %v2334_v15 = vpop.eup %2333  ;;  %v450_v16 = vadd.f32 %v449_v12, %v2912_v21  ;;  %2102 = vmatprep.mubr.f32.mxu1 %v2332_v10  ;;  %v3003_v62 = vpop.f32.mrf.mxu1 }
  0xe4   :  { %v1991_v17 = vpop.f32.mrf.mxu0  ;;  %2103 = vmatmul.mubr.f32.gmra.mxu1 %v2334_v15 }
  0xe5   :  { %2347 = vtanh.f32 %v450_v16  ;;  %v465_v23 = vadd.f32 %v1991_v17, %v2912_v21  ;;  %v3007_v7 = vpop.f32.mrf.mxu1 }
  0xe6   :  { %v2336_v22 = vpop.eup %2335  ;;  %2349 = vtanh.f32 %v455_v11  ;;  %v459_v24 = vpop.f32.mrf.mxu0 }
  0xe7   :  { %v2338_v27 = vpop.eup %2337  ;;  %v460_v28 = vadd.f32 %v459_v24, %v2912_v21  ;;  %2105 = vmatprep.mubr.f32.mxu1 %v2336_v22  ;;  %v3011_v15 = vpop.f32.mrf.mxu1  ;;  %v540_v22 = vadd.f32 %v2922_v36, %v2912_v21  ;;  %v545_v36 = vadd.f32 %v2919_v33, %v2912_v21  ;;  %v570_v33 = vadd.f32 %v2955_v63, %v2912_v21 }
  0xe8   :  { %v1994_v29 = vpop.f32.mrf.mxu0  ;;  %2106 = vmatmul.mubr.f32.gmra.mxu1 %v2338_v27  ;;  %v575_v63 = vadd.f32 %v2949_v58, %v2912_v21  ;;  %v600_v58 = vadd.f32 %v2999_v54, %v2912_v21  ;;  %v605_v54 = vadd.f32 %v2995_v45, %v2912_v21  ;;  %v615_v45 = vadd.f32 %v3003_v62, %v2912_v21 }
  0xe9   :  { %2351 = vtanh.f32 %v460_v28  ;;  %v475_v32 = vadd.f32 %v1994_v29, %v2912_v21  ;;  %v3017_v27 = vpop.f32.mrf.mxu1 }
  0xea   :  { %v2340_v31 = vpop.eup %2339  ;;  %2353 = vtanh.f32 %v465_v23  ;;  %v469_v34 = vpop.f32.mrf.mxu0 }
  0xeb   :  { %v2342_v37 = vpop.eup %2341  ;;  %v470_v38 = vadd.f32 %v469_v34, %v2912_v21  ;;  %2108 = vmatprep.mubr.f32.mxu1 %v2340_v31 }
  0xec   :  { %v1997_v40 = vpop.f32.mrf.mxu0  ;;  %2109 = vmatmul.mubr.f32.gmra.mxu1 %v2342_v37  ;;  %v560_v37 = vadd.f32 %v2943_v53, %v2912_v21 }
  0xed   :  { %2355 = vtanh.f32 %v470_v38  ;;  %v485_v43 = vadd.f32 %v1997_v40, %v2912_v21  ;;  %v555_v40 = vadd.f32 %v2925_v39, %v2912_v21 }
  0xee   :  { %v2344_v41 = vpop.eup %2343  ;;  %2357 = vtanh.f32 %v475_v32  ;;  %v479_v44 = vpop.f32.mrf.mxu0 }
  0xef   :  { %v2346_v46 = vpop.eup %2345  ;;  %v480_v47 = vadd.f32 %v479_v44, %v2912_v21  ;;  %2111 = vmatprep.mubr.f32.mxu1 %v2344_v41  ;;  %v3024_v32 = vpop.f32.mrf.mxu1  ;;  %v565_v44 = vadd.f32 %v2937_v48, %v2912_v21  ;;  %v590_v48 = vadd.f32 %v2991_v35, %v2912_v21 }
  0xf0   :  { %v2000_v49 = vpop.f32.mrf.mxu0  ;;  %2112 = vmatmul.mubr.f32.gmra.mxu1 %v2346_v46 }
  0xf1   :  { %2359 = vtanh.f32 %v480_v47  ;;  %v495_v51 = vadd.f32 %v2000_v49, %v2912_v21  ;;  %v3030_v42 = vpop.f32.mrf.mxu1  ;;  %v580_v47 = vadd.f32 %v2971_v13, %v2912_v21 }
  0xf2   :  { %v2348_v50 = vpop.eup %2347  ;;  %2361 = vtanh.f32 %v485_v43  ;;  %v489_v52 = vpop.f32.mrf.mxu0 }
  0xf3   :  { %v2350_v55 = vpop.eup %2349  ;;  %v490_v56 = vadd.f32 %v489_v52, %v2912_v21  ;;  %2114 = vmatprep.mubr.f32.mxu1 %v2348_v50  ;;  %v3036_v53 = vpop.f32.mrf.mxu1 }
  0xf4   :  { %v2003_v57 = vpop.f32.mrf.mxu0  ;;  %2115 = vmatmul.mubr.f32.gmra.mxu1 %v2350_v55  ;;  %v585_v55 = vadd.f32 %v2961_v4, %v2912_v21  ;;  %v610_v4 = vadd.f32 %v3007_v7, %v2912_v21 }
  0xf5   :  { %2363 = vtanh.f32 %v490_v56  ;;  %v505_v60 = vadd.f32 %v2003_v57, %v2912_v21  ;;  %v639_v50 = vpop.f32.mrf.mxu1 }
  0xf6   :  { %v2352_v59 = vpop.eup %2351  ;;  %2365 = vtanh.f32 %v495_v51  ;;  %v499_v61 = vpop.f32.mrf.mxu0 }
  0xf7   :  { %v2354_v0 = vpop.eup %2353  ;;  %v500_v1 = vadd.f32 %v499_v61, %v2912_v21  ;;  %2117 = vmatprep.mubr.f32.mxu1 %v2352_v59  ;;  %v3046_v13 = vpop.f32.mrf.mxu1  ;;  %v595_v59 = vadd.f32 %v2981_v25, %v2912_v21  ;;  %v98_v61 = vld [vmem:[%s3489_s1 + $0xa0] sm:$0xff] }
  0xf8   :  { %v2006_v2 = vpop.f32.mrf.mxu0  ;;  %2118 = vmatmul.mubr.f32.gmra.mxu1 %v2354_v0  ;;  %2213 = vmatprep.subr.mxu0 %v98_v61 }
  0xf9   :  { %2367 = vtanh.f32 %v500_v1  ;;  %v515_v5 = vadd.f32 %v2006_v2, %v2912_v21  ;;  %v649_v35 = vpop.f32.mrf.mxu1  ;;  %2214 = vmatpush3.msra.mxu0 %v98_v61  ;;  %v620_v2 = vadd.f32 %v3017_v27, %v2912_v21 }
  0xfa   :  { %v2356_v3 = vpop.eup %2355  ;;  %2369 = vtanh.f32 %v505_v60  ;;  %v509_v6 = vpop.f32.mrf.mxu0 }
  0xfb   :  { %v2358_v8 = vpop.eup %2357  ;;  %v510_v9 = vadd.f32 %v509_v6, %v2912_v21  ;;  %2120 = vmatprep.mubr.f32.mxu1 %v2356_v3  ;;  %v3059_v1 = vpop.f32.mrf.mxu1  ;;  %v97_v3 = vld [vmem:[%s3489_s1 + $0x98] sm:$0xff] }
  0xfc   :  { %v2009_v10 = vpop.f32.mrf.mxu0  ;;  %2121 = vmatmul.mubr.f32.gmra.mxu1 %v2358_v8  ;;  %2215 = vmatprep.subr.mxu0 %v97_v3  ;;  %v630_v8 = vadd.f32 %v3030_v42, %v2912_v21 }
  0xfd   :  { %2371 = vtanh.f32 %v510_v9  ;;  %v525_v12 = vadd.f32 %v2009_v10, %v2912_v21  ;;  %v659_v6 = vpop.f32.mrf.mxu1  ;;  %2216 = vmatpush3.msra.mxu0 %v97_v3  ;;  %v96_v9 = vld [vmem:[%s3489_s1 + $0x90] sm:$0xff] }
  0xfe   :  { %v2360_v11 = vpop.eup %2359  ;;  %2373 = vtanh.f32 %v515_v5  ;;  %v519_v14 = vpop.f32.mrf.mxu0  ;;  %2217 = vmatprep.subr.mxu0 %v96_v9 }
  0xff   :  { %v2362_v16 = vpop.eup %2361  ;;  %v520_v17 = vadd.f32 %v519_v14, %v2912_v21  ;;  %2123 = vmatprep.mubr.f32.mxu1 %v2360_v11  ;;  %v625_v11 = vadd.f32 %v3011_v15, %v2912_v21  ;;  %v2054_v62 = vpop.f32.mrf.mxu1  ;;  %2218 = vmatpush3.msra.mxu0 %v96_v9  ;;  %v640_v14 = vadd.f32 %v639_v50, %v2912_v21 }
 0x100   :  { %v2012_v19 = vpop.f32.mrf.mxu0  ;;  %2124 = vmatmul.mubr.f32.gmra.mxu1 %v2362_v16  ;;  %v95_v16 = vld [vmem:[%s3489_s1 + $0x88] sm:$0xff] }
 0x101   :  { %2375 = vtanh.f32 %v520_v17  ;;  %v535_v24 = vadd.f32 %v2012_v19, %v2912_v21  ;;  %v635_v19 = vadd.f32 %v3024_v32, %v2912_v21  ;;  %2219 = vmatprep.subr.mxu0 %v95_v16 }
 0x102   :  { %v2364_v23 = vpop.eup %2363  ;;  %2377 = vtanh.f32 %v525_v12  ;;  %v529_v26 = vpop.f32.mrf.mxu0  ;;  %2220 = vmatpush3.msra.mxu0 %v95_v16 }
 0x103   :  { %v2366_v28 = vpop.eup %2365  ;;  %v530_v29 = vadd.f32 %v529_v26, %v2912_v21  ;;  %2126 = vmatprep.mubr.f32.mxu1 %v2364_v23  ;;  %2379 = vtanh.f32 %v540_v22  ;;  %v669_v22 = vpop.f32.mrf.mxu1  ;;  %v650_v23 = vadd.f32 %v649_v35, %v2912_v21  ;;  %v645_v26 = vadd.f32 %v3036_v53, %v2912_v21 }
 0x104   :  { %2127 = vmatmul.mubr.f32.gmra.mxu1 %v2366_v28 }
 0x105   :  { %2381 = vtanh.f32 %v530_v29  ;;  %v2057_v27 = vpop.f32.mrf.mxu1  ;;  %v660_v29 = vadd.f32 %v659_v6, %v2912_v21 }
 0x106   :  { %v2368_v31 = vpop.eup %2367  ;;  %2383 = vtanh.f32 %v535_v24 }
 0x107   :  { %v2370_v34 = vpop.eup %2369  ;;  %2129 = vmatprep.mubr.f32.mxu1 %v2368_v31  ;;  %2385 = vtanh.f32 %v550_v30  ;;  %v655_v31 = vadd.f32 %v3046_v13, %v2912_v21 }
 0x108   :  { %2130 = vmatmul.mubr.f32.gmra.mxu1 %v2370_v34  ;;  %2387 = vtanh.f32 %v545_v36  ;;  %v679_v36 = vpop.f32.mrf.mxu1  ;;  %v670_v34 = vadd.f32 %v669_v22, %v2912_v21 }
 0x109   :  { %2389 = vtanh.f32 %v560_v37 }
 0x10a   :  { %v2372_v38 = vpop.eup %2371  ;;  %2391 = vtanh.f32 %v555_v40  ;;  %v2060_v40 = vpop.f32.mrf.mxu1 }
 0x10b   :  { %v2374_v41 = vpop.eup %2373  ;;  %2132 = vmatprep.mubr.f32.mxu1 %v2372_v38  ;;  %2393 = vtanh.f32 %v570_v33  ;;  %v665_v38 = vadd.f32 %v3059_v1, %v2912_v21  ;;  %v695_v50 = vadd.f32 %v2060_v40, %v2912_v21 }
 0x10c   :  { %2133 = vmatmul.mubr.f32.gmra.mxu1 %v2374_v41  ;;  %2395 = vtanh.f32 %v565_v44  ;;  %v680_v41 = vadd.f32 %v679_v36, %v2912_v21  ;;  %v689_v44 = vpop.f32.mrf.mxu1 }
 0x10d   :  { %2397 = vtanh.f32 %v580_v47  ;;  %v685_v47 = vadd.f32 %v2057_v27, %v2912_v21 }
 0x10e   :  { %v2376_v43 = vpop.eup %2375  ;;  %2399 = vtanh.f32 %v575_v63 }
 0x10f   :  { %v2378_v46 = vpop.eup %2377  ;;  %2135 = vmatprep.mubr.f32.mxu1 %v2376_v43  ;;  %2401 = vtanh.f32 %v590_v48  ;;  %v675_v43 = vadd.f32 %v2054_v62, %v2912_v21 }
 0x110   :  { %2136 = vmatmul.mubr.f32.gmra.mxu1 %v2378_v46  ;;  %v2380_v39 = vpop.eup %2379  ;;  %2403 = vtanh.f32 %v585_v55  ;;  %v690_v46 = vadd.f32 %v689_v44, %v2912_v21  ;;  %v764_v21 = vsub.s32 1, %v2903_v18 }
 0x111   :  { %2405 = vtanh.f32 %v600_v58 }
 0x112   :  { %v2382_v49 = vpop.eup %2381  ;;  %2407 = vtanh.f32 %v595_v59  ;;  %v3097_v59 = vrot.slane %v2909_v20, %v764_v21 }
 0x113   :  { %v2384_v51 = vpop.eup %2383  ;;  %2138 = vmatprep.mubr.f32.mxu1 %v2382_v49  ;;  %2409 = vtanh.f32 %v610_v4 }
 0x114   :  { %2139 = vmatmul.mubr.f32.gmra.mxu1 %v2384_v51  ;;  %v2386_v52 = vpop.eup %2385  ;;  %2411 = vtanh.f32 %v605_v54 }
 0x115   :  { %2141 = vmatprep.mubr.f32.mxu1 %v2380_v39  ;;  %v2388_v56 = vpop.eup %2387  ;;  %2413 = vtanh.f32 %v620_v2 }
 0x116   :  { %v2390_v57 = vpop.eup %2389  ;;  %2415 = vtanh.f32 %v615_v45 }
 0x117   :  { %v2392_v60 = vpop.eup %2391  ;;  %2417 = vtanh.f32 %v630_v8 }
 0x118   :  { %2142 = vmatmul.mubr.f32.gmra.mxu1 %v2388_v56  ;;  %v2394_v0 = vpop.eup %2393  ;;  %2419 = vtanh.f32 %v625_v11 }
 0x119   :  { %2144 = vmatprep.mubr.f32.mxu1 %v2386_v52  ;;  %v2396_v25 = vpop.eup %2395  ;;  %2421 = vtanh.f32 %v640_v14 }
 0x11a   :  { %v2398_v5 = vpop.eup %2397  ;;  %2423 = vtanh.f32 %v635_v19 }
 0x11b   :  { %v2400_v7 = vpop.eup %2399  ;;  %2425 = vtanh.f32 %v650_v23 }
 0x11c   :  { %2145 = vmatmul.mubr.f32.gmra.mxu1 %v2392_v60  ;;  %v2402_v10 = vpop.eup %2401  ;;  %2427 = vtanh.f32 %v645_v26 }
 0x11d   :  { %2147 = vmatprep.mubr.f32.mxu1 %v2390_v57  ;;  %v2404_v12 = vpop.eup %2403  ;;  %2429 = vtanh.f32 %v660_v29 }
 0x11e   :  { %v2406_v17 = vpop.eup %2405  ;;  %2431 = vtanh.f32 %v655_v31 }
 0x11f   :  { %v2408_v15 = vpop.eup %2407  ;;  %2433 = vtanh.f32 %v670_v34 }
 0x120   :  { %2148 = vmatmul.mubr.f32.gmra.mxu1 %v2396_v25  ;;  %v2410_v24 = vpop.eup %2409  ;;  %2435 = vtanh.f32 %v665_v38 }
 0x121   :  { %2150 = vmatprep.mubr.f32.mxu1 %v2394_v0  ;;  %v2412_v28 = vpop.eup %2411  ;;  %2437 = vtanh.f32 %v680_v41 }
 0x122   :  { %v2414_v30 = vpop.eup %2413  ;;  %2439 = vtanh.f32 %v675_v43 }
 0x123   :  { %v2416_v32 = vpop.eup %2415  ;;  %2441 = vtanh.f32 %v690_v46 }
 0x124   :  { %2151 = vmatmul.mubr.f32.gmra.mxu1 %v2400_v7  ;;  %v2418_v37 = vpop.eup %2417  ;;  %2443 = vtanh.f32 %v685_v47 }
 0x125   :  { %2153 = vmatprep.mubr.f32.mxu1 %v2398_v5  ;;  %v2420_v42 = vpop.eup %2419  ;;  %2445 = vtanh.f32 %v695_v50 }
 0x126   :  { %v2422_v33 = vpop.eup %2421 }
 0x127   :  { %v2424_v53 = vpop.eup %2423 }
 0x128   :  { %2154 = vmatmul.mubr.f32.gmra.mxu1 %v2404_v12  ;;  %v2426_v39 = vpop.eup %2425 }
 0x129   :  { %2156 = vmatprep.mubr.f32.mxu1 %v2402_v10  ;;  %v2428_v49 = vpop.eup %2427 }
 0x12a   :  { %v2430_v63 = vpop.eup %2429 }
 0x12b   :  { %v2432_v51 = vpop.eup %2431 }
 0x12c   :  { %2157 = vmatmul.mubr.f32.gmra.mxu1 %v2408_v15  ;;  %v2434_v48 = vpop.eup %2433 }
 0x12d   :  { %2159 = vmatprep.mubr.f32.mxu1 %v2406_v17  ;;  %v2436_v52 = vpop.eup %2435 }
 0x12e   :  { %v2438_v55 = vpop.eup %2437 }
 0x12f   :  { %v2440_v13 = vpop.eup %2439 }
 0x130   :  { %2160 = vmatmul.mubr.f32.gmra.mxu1 %v2412_v28  ;;  %v2442_v56 = vpop.eup %2441 }
 0x131   :  { %2162 = vmatprep.mubr.f32.mxu1 %v2410_v24  ;;  %v2444_v58 = vpop.eup %2443 }
 0x132   :  { %v2446_v57 = vpop.eup %2445 }
 0x134   :  { %2163 = vmatmul.mubr.f32.gmra.mxu1 %v2416_v32 }
 0x135   :  { %2165 = vmatprep.mubr.f32.mxu1 %v2414_v30 }
 0x138   :  { %2166 = vmatmul.mubr.f32.gmra.mxu1 %v2420_v42 }
 0x139   :  { %2168 = vmatprep.mubr.f32.mxu1 %v2418_v37 }
 0x13c   :  { %2169 = vmatmul.mubr.f32.gmra.mxu1 %v2424_v53 }
 0x13d   :  { %2171 = vmatprep.mubr.f32.mxu1 %v2422_v33 }
 0x140   :  { %2172 = vmatmul.mubr.f32.gmra.mxu1 %v2428_v49 }
 0x141   :  { %2174 = vmatprep.mubr.f32.mxu1 %v2426_v39 }
 0x144   :  { %2175 = vmatmul.mubr.f32.gmra.mxu1 %v2432_v51 }
 0x145   :  { %2177 = vmatprep.mubr.f32.mxu1 %v2430_v63 }
 0x148   :  { %2178 = vmatmul.mubr.f32.gmra.mxu1 %v2436_v52 }
 0x149   :  { %2180 = vmatprep.mubr.f32.mxu1 %v2434_v48 }
 0x14c   :  { %2181 = vmatmul.mubr.f32.gmra.mxu1 %v2440_v13 }
 0x14d   :  { %2183 = vmatprep.mubr.f32.mxu1 %v2438_v55 }
 0x150   :  { %2184 = vmatmul.mubr.f32.gmra.mxu1 %v2444_v58 }
 0x151   :  { %2186 = vmatprep.mubr.f32.mxu1 %v2442_v56 }
 0x154   :  { %2187 = vmatmul.mubr.f32.gmra.mxu1 %v2446_v57 }
 0x198   :  { %v2095_v35 = vpop.f32.mrf.mxu1 }
 0x199   :  { %v838_v60 = vadd.f32 %v2095_v35, %v3097_v59 }
 0x19a   :  { %v832_v4 = vpop.f32.mrf.mxu1 }
 0x19b   :  { %v833_v61 = vadd.f32 %v832_v4, %v3097_v59 }
 0x19c   :  { %v2098_v0 = vpop.f32.mrf.mxu1 }
 0x19d   :  { %2447 = vtanh.f32 %v833_v61  ;;  %v848_v54 = vadd.f32 %v2098_v0, %v3097_v59 }
 0x19e   :  { %2449 = vtanh.f32 %v838_v60  ;;  %v842_v1 = vpop.f32.mrf.mxu1 }
 0x19f   :  { %v843_v25 = vadd.f32 %v842_v1, %v3097_v59 }
 0x1a0   :  { %v2101_v2 = vpop.f32.mrf.mxu1 }
 0x1a1   :  { %2451 = vtanh.f32 %v843_v25  ;;  %v858_v20 = vadd.f32 %v2101_v2, %v3097_v59 }
 0x1a2   :  { %2453 = vtanh.f32 %v848_v54  ;;  %v852_v3 = vpop.f32.mrf.mxu1 }
 0x1a3   :  { %v853_v5 = vadd.f32 %v852_v3, %v3097_v59 }
 0x1a4   :  { %v2104_v45 = vpop.f32.mrf.mxu1 }
 0x1a5   :  { %2455 = vtanh.f32 %v853_v5  ;;  %v868_v6 = vadd.f32 %v2104_v45, %v3097_v59 }
 0x1a6   :  { %2457 = vtanh.f32 %v858_v20  ;;  %v862_v7 = vpop.f32.mrf.mxu1 }
 0x1a7   :  { %v863_v8 = vadd.f32 %v862_v7, %v3097_v59 }
 0x1a8   :  { %v2107_v9 = vpop.f32.mrf.mxu1 }
 0x1a9   :  { %2459 = vtanh.f32 %v863_v8  ;;  %v878_v11 = vadd.f32 %v2107_v9, %v3097_v59 }
 0x1aa   :  { %v2448_v10 = vpop.eup %2447  ;;  %2461 = vtanh.f32 %v868_v6  ;;  %v872_v62 = vpop.f32.mrf.mxu1 }
 0x1ab   :  { %v2450_v12 = vpop.eup %2449  ;;  %v873_v14 = vadd.f32 %v872_v62, %v3097_v59  ;;  %2221 = vmatprep.mubr.f32.mxu0 %v2448_v10 }
 0x1ac   :  { %v2110_v16 = vpop.f32.mrf.mxu1  ;;  %2222 = vmatmul.mubr.f32.vlgmr.msra.gmra.mxu0 %v2450_v12 }
 0x1ad   :  { %2463 = vtanh.f32 %v873_v14  ;;  %v888_v19 = vadd.f32 %v2110_v16, %v3097_v59 }
 0x1ae   :  { %v2452_v17 = vpop.eup %2451  ;;  %2465 = vtanh.f32 %v878_v11  ;;  %v882_v22 = vpop.f32.mrf.mxu1 }
 0x1af   :  { %v2454_v15 = vpop.eup %2453  ;;  %v883_v23 = vadd.f32 %v882_v22, %v3097_v59  ;;  %2224 = vmatprep.mubr.f32.mxu0 %v2452_v17 }
 0x1b0   :  { %v2113_v24 = vpop.f32.mrf.mxu1  ;;  %2225 = vmatmul.mubr.f32.gmra.mxu0 %v2454_v15 }
 0x1b1   :  { %2467 = vtanh.f32 %v883_v23  ;;  %v898_v27 = vadd.f32 %v2113_v24, %v3097_v59 }
 0x1b2   :  { %v2456_v26 = vpop.eup %2455  ;;  %2469 = vtanh.f32 %v888_v19  ;;  %v892_v28 = vpop.f32.mrf.mxu1 }
 0x1b3   :  { %v2458_v29 = vpop.eup %2457  ;;  %v893_v30 = vadd.f32 %v892_v28, %v3097_v59  ;;  %2227 = vmatprep.mubr.f32.mxu0 %v2456_v26 }
 0x1b4   :  { %v2116_v31 = vpop.f32.mrf.mxu1  ;;  %2228 = vmatmul.mubr.f32.gmra.mxu0 %v2458_v29 }
 0x1b5   :  { %2471 = vtanh.f32 %v893_v30  ;;  %v908_v32 = vadd.f32 %v2116_v31, %v3097_v59 }
 0x1b6   :  { %v2460_v36 = vpop.eup %2459  ;;  %2473 = vtanh.f32 %v898_v27  ;;  %v902_v34 = vpop.f32.mrf.mxu1 }
 0x1b7   :  { %v2462_v37 = vpop.eup %2461  ;;  %v903_v38 = vadd.f32 %v902_v34, %v3097_v59  ;;  %2230 = vmatprep.mubr.f32.mxu0 %v2460_v36 }
 0x1b8   :  { %v2119_v40 = vpop.f32.mrf.mxu1  ;;  %2231 = vmatmul.mubr.f32.gmra.mxu0 %v2462_v37 }
 0x1b9   :  { %2475 = vtanh.f32 %v903_v38  ;;  %v918_v41 = vadd.f32 %v2119_v40, %v3097_v59 }
 0x1ba   :  { %v2464_v42 = vpop.eup %2463  ;;  %2477 = vtanh.f32 %v908_v32  ;;  %v912_v33 = vpop.f32.mrf.mxu1 }
 0x1bb   :  { %v2466_v43 = vpop.eup %2465  ;;  %v913_v44 = vadd.f32 %v912_v33, %v3097_v59  ;;  %2233 = vmatprep.mubr.f32.mxu0 %v2464_v42 }
 0x1bc   :  { %v2122_v53 = vpop.f32.mrf.mxu1  ;;  %2234 = vmatmul.mubr.f32.gmra.mxu0 %v2466_v43 }
 0x1bd   :  { %2479 = vtanh.f32 %v913_v44  ;;  %v928_v39 = vadd.f32 %v2122_v53, %v3097_v59 }
 0x1be   :  { %v2468_v46 = vpop.eup %2467  ;;  %2481 = vtanh.f32 %v918_v41  ;;  %v922_v47 = vpop.f32.mrf.mxu1 }
 0x1bf   :  { %v2470_v49 = vpop.eup %2469  ;;  %v923_v63 = vadd.f32 %v922_v47, %v3097_v59  ;;  %2236 = vmatprep.mubr.f32.mxu0 %v2468_v46 }
 0x1c0   :  { %v2125_v50 = vpop.f32.mrf.mxu1  ;;  %2237 = vmatmul.mubr.f32.gmra.mxu0 %v2470_v49 }
 0x1c1   :  { %2483 = vtanh.f32 %v923_v63  ;;  %v938_v48 = vadd.f32 %v2125_v50, %v3097_v59 }
 0x1c2   :  { %v2472_v51 = vpop.eup %2471  ;;  %2485 = vtanh.f32 %v928_v39  ;;  %v932_v52 = vpop.f32.mrf.mxu1 }
 0x1c3   :  { %v2474_v55 = vpop.eup %2473  ;;  %v933_v13 = vadd.f32 %v932_v52, %v3097_v59  ;;  %2239 = vmatprep.mubr.f32.mxu0 %v2472_v51 }
 0x1c4   :  { %v2128_v56 = vpop.f32.mrf.mxu1  ;;  %2240 = vmatmul.mubr.f32.gmra.mxu0 %v2474_v55 }
 0x1c5   :  { %2487 = vtanh.f32 %v933_v13  ;;  %v948_v57 = vadd.f32 %v2128_v56, %v3097_v59 }
 0x1c6   :  { %v2476_v58 = vpop.eup %2475  ;;  %2489 = vtanh.f32 %v938_v48  ;;  %v942_v21 = vpop.f32.mrf.mxu1 }
 0x1c7   :  { %v2478_v35 = vpop.eup %2477  ;;  %v943_v60 = vadd.f32 %v942_v21, %v3097_v59  ;;  %2242 = vmatprep.mubr.f32.mxu0 %v2476_v58 }
 0x1c8   :  { %v2131_v4 = vpop.f32.mrf.mxu1  ;;  %2243 = vmatmul.mubr.f32.gmra.mxu0 %v2478_v35 }
 0x1c9   :  { %2491 = vtanh.f32 %v943_v60  ;;  %v958_v0 = vadd.f32 %v2131_v4, %v3097_v59 }
 0x1ca   :  { %v2480_v61 = vpop.eup %2479  ;;  %2493 = vtanh.f32 %v948_v57  ;;  %v952_v54 = vpop.f32.mrf.mxu1 }
 0x1cb   :  { %v2482_v1 = vpop.eup %2481  ;;  %v953_v25 = vadd.f32 %v952_v54, %v3097_v59  ;;  %2245 = vmatprep.mubr.f32.mxu0 %v2480_v61 }
 0x1cc   :  { %v2134_v2 = vpop.f32.mrf.mxu1  ;;  %2246 = vmatmul.mubr.f32.gmra.mxu0 %v2482_v1 }
 0x1cd   :  { %2495 = vtanh.f32 %v953_v25  ;;  %v968_v3 = vadd.f32 %v2134_v2, %v3097_v59 }
 0x1ce   :  { %v2484_v20 = vpop.eup %2483  ;;  %2497 = vtanh.f32 %v958_v0  ;;  %v962_v5 = vpop.f32.mrf.mxu1 }
 0x1cf   :  { %v2486_v45 = vpop.eup %2485  ;;  %v963_v6 = vadd.f32 %v962_v5, %v3097_v59  ;;  %2248 = vmatprep.mubr.f32.mxu0 %v2484_v20 }
 0x1d0   :  { %v2137_v7 = vpop.f32.mrf.mxu1  ;;  %2249 = vmatmul.mubr.f32.gmra.mxu0 %v2486_v45 }
 0x1d1   :  { %2499 = vtanh.f32 %v963_v6  ;;  %v978_v9 = vadd.f32 %v2137_v7, %v3097_v59 }
 0x1d2   :  { %v2488_v8 = vpop.eup %2487  ;;  %2501 = vtanh.f32 %v968_v3  ;;  %v972_v10 = vpop.f32.mrf.mxu1 }
 0x1d3   :  { %v2490_v11 = vpop.eup %2489  ;;  %v973_v62 = vadd.f32 %v972_v10, %v3097_v59  ;;  %2251 = vmatprep.mubr.f32.mxu0 %v2488_v8 }
 0x1d4   :  { %v2140_v12 = vpop.f32.mrf.mxu1  ;;  %2252 = vmatmul.mubr.f32.gmra.mxu0 %v2490_v11 }
 0x1d5   :  { %2503 = vtanh.f32 %v973_v62  ;;  %v988_v16 = vadd.f32 %v2140_v12, %v3097_v59 }
 0x1d6   :  { %v2492_v14 = vpop.eup %2491  ;;  %2505 = vtanh.f32 %v978_v9  ;;  %v982_v17 = vpop.f32.mrf.mxu1 }
 0x1d7   :  { %v2494_v19 = vpop.eup %2493  ;;  %v983_v22 = vadd.f32 %v982_v17, %v3097_v59  ;;  %2254 = vmatprep.mubr.f32.mxu0 %v2492_v14 }
 0x1d8   :  { %v2143_v15 = vpop.f32.mrf.mxu1  ;;  %2255 = vmatmul.mubr.f32.gmra.mxu0 %v2494_v19 }
 0x1d9   :  { %2507 = vtanh.f32 %v983_v22  ;;  %v998_v24 = vadd.f32 %v2143_v15, %v3097_v59 }
 0x1da   :  { %v2496_v23 = vpop.eup %2495  ;;  %2509 = vtanh.f32 %v988_v16  ;;  %v992_v26 = vpop.f32.mrf.mxu1 }
 0x1db   :  { %v2498_v27 = vpop.eup %2497  ;;  %v993_v28 = vadd.f32 %v992_v26, %v3097_v59  ;;  %2257 = vmatprep.mubr.f32.mxu0 %v2496_v23 }
 0x1dc   :  { %v2146_v29 = vpop.f32.mrf.mxu1  ;;  %2258 = vmatmul.mubr.f32.gmra.mxu0 %v2498_v27 }
 0x1dd   :  { %2511 = vtanh.f32 %v993_v28  ;;  %v1008_v31 = vadd.f32 %v2146_v29, %v3097_v59 }
 0x1de   :  { %v2500_v30 = vpop.eup %2499  ;;  %2513 = vtanh.f32 %v998_v24  ;;  %v1002_v36 = vpop.f32.mrf.mxu1 }
 0x1df   :  { %v2502_v32 = vpop.eup %2501  ;;  %v1003_v34 = vadd.f32 %v1002_v36, %v3097_v59  ;;  %2260 = vmatprep.mubr.f32.mxu0 %v2500_v30 }
 0x1e0   :  { %v2149_v37 = vpop.f32.mrf.mxu1  ;;  %2261 = vmatmul.mubr.f32.gmra.mxu0 %v2502_v32 }
 0x1e1   :  { %2515 = vtanh.f32 %v1003_v34  ;;  %v1018_v40 = vadd.f32 %v2149_v37, %v3097_v59 }
 0x1e2   :  { %v2504_v38 = vpop.eup %2503  ;;  %2517 = vtanh.f32 %v1008_v31  ;;  %v1012_v42 = vpop.f32.mrf.mxu1 }
 0x1e3   :  { %v2506_v41 = vpop.eup %2505  ;;  %v1013_v33 = vadd.f32 %v1012_v42, %v3097_v59  ;;  %2263 = vmatprep.mubr.f32.mxu0 %v2504_v38 }
 0x1e4   :  { %v2152_v43 = vpop.f32.mrf.mxu1  ;;  %2264 = vmatmul.mubr.f32.gmra.mxu0 %v2506_v41 }
 0x1e5   :  { %2519 = vtanh.f32 %v1013_v33  ;;  %v1028_v53 = vadd.f32 %v2152_v43, %v3097_v59 }
 0x1e6   :  { %v2508_v44 = vpop.eup %2507  ;;  %2521 = vtanh.f32 %v1018_v40  ;;  %v1022_v46 = vpop.f32.mrf.mxu1 }
 0x1e7   :  { %v2510_v39 = vpop.eup %2509  ;;  %v1023_v47 = vadd.f32 %v1022_v46, %v3097_v59  ;;  %2266 = vmatprep.mubr.f32.mxu0 %v2508_v44 }
 0x1e8   :  { %v2155_v49 = vpop.f32.mrf.mxu1  ;;  %2267 = vmatmul.mubr.f32.gmra.mxu0 %v2510_v39 }
 0x1e9   :  { %2523 = vtanh.f32 %v1023_v47  ;;  %v1038_v50 = vadd.f32 %v2155_v49, %v3097_v59 }
 0x1ea   :  { %v2512_v63 = vpop.eup %2511  ;;  %2525 = vtanh.f32 %v1028_v53  ;;  %v1032_v51 = vpop.f32.mrf.mxu1 }
 0x1eb   :  { %v2514_v48 = vpop.eup %2513  ;;  %v1033_v52 = vadd.f32 %v1032_v51, %v3097_v59  ;;  %2269 = vmatprep.mubr.f32.mxu0 %v2512_v63 }
 0x1ec   :  { %v2158_v55 = vpop.f32.mrf.mxu1  ;;  %2270 = vmatmul.mubr.f32.gmra.mxu0 %v2514_v48 }
 0x1ed   :  { %2527 = vtanh.f32 %v1033_v52  ;;  %v1048_v56 = vadd.f32 %v2158_v55, %v3097_v59 }
 0x1ee   :  { %v2516_v13 = vpop.eup %2515  ;;  %2529 = vtanh.f32 %v1038_v50  ;;  %v1042_v58 = vpop.f32.mrf.mxu1 }
 0x1ef   :  { %v2518_v57 = vpop.eup %2517  ;;  %v1043_v21 = vadd.f32 %v1042_v58, %v3097_v59  ;;  %2272 = vmatprep.mubr.f32.mxu0 %v2516_v13 }
 0x1f0   :  { %v2161_v35 = vpop.f32.mrf.mxu1  ;;  %2273 = vmatmul.mubr.f32.gmra.mxu0 %v2518_v57 }
 0x1f1   :  { %2531 = vtanh.f32 %v1043_v21  ;;  %v1058_v4 = vadd.f32 %v2161_v35, %v3097_v59 }
 0x1f2   :  { %v2520_v60 = vpop.eup %2519  ;;  %2533 = vtanh.f32 %v1048_v56  ;;  %v1052_v61 = vpop.f32.mrf.mxu1 }
 0x1f3   :  { %v2522_v0 = vpop.eup %2521  ;;  %v1053_v54 = vadd.f32 %v1052_v61, %v3097_v59  ;;  %2275 = vmatprep.mubr.f32.mxu0 %v2520_v60 }
 0x1f4   :  { %v2164_v1 = vpop.f32.mrf.mxu1  ;;  %2276 = vmatmul.mubr.f32.gmra.mxu0 %v2522_v0 }
 0x1f5   :  { %2535 = vtanh.f32 %v1053_v54  ;;  %v1068_v2 = vadd.f32 %v2164_v1, %v3097_v59  ;;  %v2575_v1 = vld [vmem:[%s3491_s2] sm:$0xff] }
 0x1f6   :  { %v2524_v25 = vpop.eup %2523  ;;  %2537 = vtanh.f32 %v1058_v4  ;;  %v1062_v20 = vpop.f32.mrf.mxu1 }
 0x1f7   :  { %v2526_v3 = vpop.eup %2525  ;;  %v1063_v5 = vadd.f32 %v1062_v20, %v3097_v59  ;;  %2278 = vmatprep.mubr.f32.mxu0 %v2524_v25 }
 0x1f8   :  { %v2167_v45 = vpop.f32.mrf.mxu1  ;;  %2279 = vmatmul.mubr.f32.gmra.mxu0 %v2526_v3 }
 0x1f9   :  { %2539 = vtanh.f32 %v1063_v5  ;;  %v1078_v7 = vadd.f32 %v2167_v45, %v3097_v59 }
 0x1fa   :  { %v2528_v6 = vpop.eup %2527  ;;  %2541 = vtanh.f32 %v1068_v2  ;;  %v1072_v8 = vpop.f32.mrf.mxu1 }
 0x1fb   :  { %v2530_v9 = vpop.eup %2529  ;;  %v1073_v10 = vadd.f32 %v1072_v8, %v3097_v59  ;;  %2281 = vmatprep.mubr.f32.mxu0 %v2528_v6 }
 0x1fc   :  { %v2170_v11 = vpop.f32.mrf.mxu1  ;;  %2282 = vmatmul.mubr.f32.gmra.mxu0 %v2530_v9 }
 0x1fd   :  { %2543 = vtanh.f32 %v1073_v10  ;;  %v1088_v12 = vadd.f32 %v2170_v11, %v3097_v59 }
 0x1fe   :  { %v2532_v62 = vpop.eup %2531  ;;  %2545 = vtanh.f32 %v1078_v7  ;;  %v1082_v14 = vpop.f32.mrf.mxu1 }
 0x1ff   :  { %v2534_v16 = vpop.eup %2533  ;;  %v1083_v17 = vadd.f32 %v1082_v14, %v3097_v59  ;;  %2284 = vmatprep.mubr.f32.mxu0 %v2532_v62 }
 0x200   :  { %v2173_v19 = vpop.f32.mrf.mxu1  ;;  %2285 = vmatmul.mubr.f32.gmra.mxu0 %v2534_v16 }
 0x201   :  { %2547 = vtanh.f32 %v1083_v17  ;;  %v1098_v15 = vadd.f32 %v2173_v19, %v3097_v59 }
 0x202   :  { %v2536_v22 = vpop.eup %2535  ;;  %2549 = vtanh.f32 %v1088_v12  ;;  %v1092_v23 = vpop.f32.mrf.mxu1 }
 0x203   :  { %v2538_v24 = vpop.eup %2537  ;;  %v1093_v26 = vadd.f32 %v1092_v23, %v3097_v59  ;;  %2287 = vmatprep.mubr.f32.mxu0 %v2536_v22 }
 0x204   :  { %v2176_v27 = vpop.f32.mrf.mxu1  ;;  %2288 = vmatmul.mubr.f32.gmra.mxu0 %v2538_v24 }
 0x205   :  { %2551 = vtanh.f32 %v1093_v26  ;;  %v1108_v29 = vadd.f32 %v2176_v27, %v3097_v59 }
 0x206   :  { %v2540_v28 = vpop.eup %2539  ;;  %2553 = vtanh.f32 %v1098_v15  ;;  %v1102_v30 = vpop.f32.mrf.mxu1 }
 0x207   :  { %v2542_v31 = vpop.eup %2541  ;;  %v1103_v36 = vadd.f32 %v1102_v30, %v3097_v59  ;;  %2290 = vmatprep.mubr.f32.mxu0 %v2540_v28 }
 0x208   :  { %v2179_v32 = vpop.f32.mrf.mxu1  ;;  %2291 = vmatmul.mubr.f32.gmra.mxu0 %v2542_v31 }
 0x209   :  { %2555 = vtanh.f32 %v1103_v36  ;;  %v1118_v37 = vadd.f32 %v2179_v32, %v3097_v59 }
 0x20a   :  { %v2544_v34 = vpop.eup %2543  ;;  %2557 = vtanh.f32 %v1108_v29  ;;  %v1112_v38 = vpop.f32.mrf.mxu1 }
 0x20b   :  { %v2546_v40 = vpop.eup %2545  ;;  %v1113_v42 = vadd.f32 %v1112_v38, %v3097_v59  ;;  %2293 = vmatprep.mubr.f32.mxu0 %v2544_v34 }
 0x20c   :  { %v2182_v41 = vpop.f32.mrf.mxu1  ;;  %2294 = vmatmul.mubr.f32.gmra.mxu0 %v2546_v40 }
 0x20d   :  { %2559 = vtanh.f32 %v1113_v42  ;;  %v1128_v43 = vadd.f32 %v2182_v41, %v3097_v59 }
 0x20e   :  { %v2548_v33 = vpop.eup %2547  ;;  %2561 = vtanh.f32 %v1118_v37  ;;  %v1122_v44 = vpop.f32.mrf.mxu1 }
 0x20f   :  { %v2550_v53 = vpop.eup %2549  ;;  %v1123_v46 = vadd.f32 %v1122_v44, %v3097_v59  ;;  %2296 = vmatprep.mubr.f32.mxu0 %v2548_v33 }
 0x210   :  { %v2185_v39 = vpop.f32.mrf.mxu1  ;;  %2297 = vmatmul.mubr.f32.gmra.mxu0 %v2550_v53 }
 0x211   :  { %2563 = vtanh.f32 %v1123_v46  ;;  %v1138_v49 = vadd.f32 %v2185_v39, %v3097_v59 }
 0x212   :  { %v2552_v47 = vpop.eup %2551  ;;  %2565 = vtanh.f32 %v1128_v43  ;;  %v1132_v63 = vpop.f32.mrf.mxu1 }
 0x213   :  { %v2554_v50 = vpop.eup %2553  ;;  %v1133_v51 = vadd.f32 %v1132_v63, %v3097_v59  ;;  %2299 = vmatprep.mubr.f32.mxu0 %v2552_v47 }
 0x214   :  { %v2188_v48 = vpop.f32.mrf.mxu1  ;;  %2300 = vmatmul.mubr.f32.gmra.mxu0 %v2554_v50 }
 0x215   :  { %2567 = vtanh.f32 %v1133_v51  ;;  %v1148_v55 = vadd.f32 %v2188_v48, %v3097_v59 }
 0x216   :  { %v2556_v52 = vpop.eup %2555  ;;  %2569 = vtanh.f32 %v1138_v49  ;;  %v1142_v13 = vpop.f32.mrf.mxu1 }
 0x217   :  { %v2558_v56 = vpop.eup %2557  ;;  %v1143_v58 = vadd.f32 %v1142_v13, %v3097_v59  ;;  %2302 = vmatprep.mubr.f32.mxu0 %v2556_v52  ;;  %v1217_v59 = vsub.s32 2, %v2903_v18 }
 0x218   :  { %2303 = vmatmul.mubr.f32.gmra.mxu0 %v2558_v56 }
 0x219   :  { %2571 = vtanh.f32 %v1143_v58  ;;  %v3167_v25 = vrot.slane %v2575_v1, %v1217_v59 }
 0x21a   :  { %v2560_v57 = vpop.eup %2559  ;;  %2573 = vtanh.f32 %v1148_v55 }
 0x21b   :  { %v2562_v21 = vpop.eup %2561  ;;  %2305 = vmatprep.mubr.f32.mxu0 %v2560_v57 }
 0x21c   :  { %2306 = vmatmul.mubr.f32.gmra.mxu0 %v2562_v21 }
 0x21e   :  { %v2564_v35 = vpop.eup %2563 }
 0x21f   :  { %v2566_v60 = vpop.eup %2565  ;;  %2308 = vmatprep.mubr.f32.mxu0 %v2564_v35 }
 0x220   :  { %2309 = vmatmul.mubr.f32.gmra.mxu0 %v2566_v60 }
 0x222   :  { %v2568_v4 = vpop.eup %2567 }
 0x223   :  { %v2570_v61 = vpop.eup %2569  ;;  %2311 = vmatprep.mubr.f32.mxu0 %v2568_v4 }
 0x224   :  { %2312 = vmatmul.mubr.f32.gmra.mxu0 %v2570_v61 }
 0x226   :  { %v2572_v0 = vpop.eup %2571 }
 0x227   :  { %v2574_v54 = vpop.eup %2573  ;;  %2314 = vmatprep.mubr.f32.mxu0 %v2572_v0 }
 0x228   :  { %2315 = vmatmul.mubr.f32.gmra.mxu0 %v2574_v54 }
 0x26c   :  { %v2223_v2 = vpop.f32.mrf.mxu0 }
 0x26d   :  { %v1291_v20 = vadd.f32 %v2223_v2, %v3167_v25 }
 0x26e   :  { %v1285_v3 = vpop.f32.mrf.mxu0 }
 0x26f   :  { %1606 = vst.msk [vmem:[%s3492_s3 + $0x8] sm:$0xff] %vm1604_vm2, %v1291_v20  ;;  %v1286_v5 = vadd.f32 %v1285_v3, %v3167_v25 }
 0x270   :  { %v2226_v45 = vpop.f32.mrf.mxu0 }
 0x271   :  { %1605 = vst.msk [vmem:[%s3492_s3] sm:$0xff] %vm1604_vm2, %v1286_v5  ;;  %v1301_v18 = vadd.f32 %v2226_v45, %v3167_v25 }
 0x272   :  { %v1295_v6 = vpop.f32.mrf.mxu0 }
 0x273   :  { %1608 = vst.msk [vmem:[%s3492_s3 + $0x18] sm:$0xff] %vm1604_vm2, %v1301_v18  ;;  %v1296_v7 = vadd.f32 %v1295_v6, %v3167_v25 }
 0x274   :  { %v2229_v8 = vpop.f32.mrf.mxu0 }
 0x275   :  { %1607 = vst.msk [vmem:[%s3492_s3 + $0x10] sm:$0xff] %vm1604_vm2, %v1296_v7  ;;  %v1311_v9 = vadd.f32 %v2229_v8, %v3167_v25 }
 0x276   :  { %v1305_v10 = vpop.f32.mrf.mxu0 }
 0x277   :  { %1610 = vst.msk [vmem:[%s3492_s3 + $0x28] sm:$0xff] %vm1604_vm2, %v1311_v9  ;;  %v1306_v11 = vadd.f32 %v1305_v10, %v3167_v25 }
 0x278   :  { %v2232_v62 = vpop.f32.mrf.mxu0 }
 0x279   :  { %1609 = vst.msk [vmem:[%s3492_s3 + $0x20] sm:$0xff] %vm1604_vm2, %v1306_v11  ;;  %v1321_v12 = vadd.f32 %v2232_v62, %v3167_v25 }
 0x27a   :  { %v1315_v14 = vpop.f32.mrf.mxu0 }
 0x27b   :  { %1612 = vst.msk [vmem:[%s3492_s3 + $0x38] sm:$0xff] %vm1604_vm2, %v1321_v12  ;;  %v1316_v16 = vadd.f32 %v1315_v14, %v3167_v25 }
 0x27c   :  { %v2235_v17 = vpop.f32.mrf.mxu0 }
 0x27d   :  { %1611 = vst.msk [vmem:[%s3492_s3 + $0x30] sm:$0xff] %vm1604_vm2, %v1316_v16  ;;  %v1331_v19 = vadd.f32 %v2235_v17, %v3167_v25 }
 0x27e   :  { %v1325_v22 = vpop.f32.mrf.mxu0 }
 0x27f   :  { %1614 = vst.msk [vmem:[%s3492_s3 + $0x48] sm:$0xff] %vm1604_vm2, %v1331_v19  ;;  %v1326_v15 = vadd.f32 %v1325_v22, %v3167_v25 }
 0x280   :  { %v2238_v23 = vpop.f32.mrf.mxu0 }
 0x281   :  { %1613 = vst.msk [vmem:[%s3492_s3 + $0x40] sm:$0xff] %vm1604_vm2, %v1326_v15  ;;  %v1341_v24 = vadd.f32 %v2238_v23, %v3167_v25 }
 0x282   :  { %v1335_v26 = vpop.f32.mrf.mxu0 }
 0x283   :  { %1616 = vst.msk [vmem:[%s3492_s3 + $0x58] sm:$0xff] %vm1604_vm2, %v1341_v24  ;;  %v1336_v27 = vadd.f32 %v1335_v26, %v3167_v25 }
 0x284   :  { %v2241_v28 = vpop.f32.mrf.mxu0 }
 0x285   :  { %1615 = vst.msk [vmem:[%s3492_s3 + $0x50] sm:$0xff] %vm1604_vm2, %v1336_v27  ;;  %v1351_v29 = vadd.f32 %v2241_v28, %v3167_v25 }
 0x286   :  { %v1345_v30 = vpop.f32.mrf.mxu0 }
 0x287   :  { %1618 = vst.msk [vmem:[%s3492_s3 + $0x68] sm:$0xff] %vm1604_vm2, %v1351_v29  ;;  %v1346_v31 = vadd.f32 %v1345_v30, %v3167_v25 }
 0x288   :  { %v2244_v36 = vpop.f32.mrf.mxu0 }
 0x289   :  { %1617 = vst.msk [vmem:[%s3492_s3 + $0x60] sm:$0xff] %vm1604_vm2, %v1346_v31  ;;  %v1361_v32 = vadd.f32 %v2244_v36, %v3167_v25 }
 0x28a   :  { %v1355_v34 = vpop.f32.mrf.mxu0 }
 0x28b   :  { %1620 = vst.msk [vmem:[%s3492_s3 + $0x78] sm:$0xff] %vm1604_vm2, %v1361_v32  ;;  %v1356_v37 = vadd.f32 %v1355_v34, %v3167_v25 }
 0x28c   :  { %v2247_v38 = vpop.f32.mrf.mxu0 }
 0x28d   :  { %1619 = vst.msk [vmem:[%s3492_s3 + $0x70] sm:$0xff] %vm1604_vm2, %v1356_v37  ;;  %v1371_v40 = vadd.f32 %v2247_v38, %v3167_v25 }
 0x28e   :  { %v1365_v42 = vpop.f32.mrf.mxu0 }
 0x28f   :  { %1622 = vst.msk [vmem:[%s3492_s3 + $0x88] sm:$0xff] %vm1604_vm2, %v1371_v40  ;;  %v1366_v41 = vadd.f32 %v1365_v42, %v3167_v25 }
 0x290   :  { %v2250_v33 = vpop.f32.mrf.mxu0 }
 0x291   :  { %1621 = vst.msk [vmem:[%s3492_s3 + $0x80] sm:$0xff] %vm1604_vm2, %v1366_v41  ;;  %v1381_v43 = vadd.f32 %v2250_v33, %v3167_v25 }
 0x292   :  { %v1375_v44 = vpop.f32.mrf.mxu0 }
 0x293   :  { %1624 = vst.msk [vmem:[%s3492_s3 + $0x98] sm:$0xff] %vm1604_vm2, %v1381_v43  ;;  %v1376_v53 = vadd.f32 %v1375_v44, %v3167_v25 }
 0x294   :  { %v2253_v46 = vpop.f32.mrf.mxu0 }
 0x295   :  { %1623 = vst.msk [vmem:[%s3492_s3 + $0x90] sm:$0xff] %vm1604_vm2, %v1376_v53  ;;  %v1391_v39 = vadd.f32 %v2253_v46, %v3167_v25 }
 0x296   :  { %v1385_v47 = vpop.f32.mrf.mxu0 }
 0x297   :  { %1626 = vst.msk [vmem:[%s3492_s3 + $0xa8] sm:$0xff] %vm1604_vm2, %v1391_v39  ;;  %v1386_v49 = vadd.f32 %v1385_v47, %v3167_v25 }
 0x298   :  { %v2256_v63 = vpop.f32.mrf.mxu0 }
 0x299   :  { %1625 = vst.msk [vmem:[%s3492_s3 + $0xa0] sm:$0xff] %vm1604_vm2, %v1386_v49  ;;  %v1401_v50 = vadd.f32 %v2256_v63, %v3167_v25 }
 0x29a   :  { %v1395_v51 = vpop.f32.mrf.mxu0 }
 0x29b   :  { %1628 = vst.msk [vmem:[%s3492_s3 + $0xb8] sm:$0xff] %vm1604_vm2, %v1401_v50  ;;  %v1396_v48 = vadd.f32 %v1395_v51, %v3167_v25 }
 0x29c   :  { %v2259_v52 = vpop.f32.mrf.mxu0 }
 0x29d   :  { %1627 = vst.msk [vmem:[%s3492_s3 + $0xb0] sm:$0xff] %vm1604_vm2, %v1396_v48  ;;  %v1411_v55 = vadd.f32 %v2259_v52, %v3167_v25 }
 0x29e   :  { %v1405_v13 = vpop.f32.mrf.mxu0 }
 0x29f   :  { %1630 = vst.msk [vmem:[%s3492_s3 + $0xc8] sm:$0xff] %vm1604_vm2, %v1411_v55  ;;  %v1406_v56 = vadd.f32 %v1405_v13, %v3167_v25 }
 0x2a0   :  { %v2262_v58 = vpop.f32.mrf.mxu0 }
 0x2a1   :  { %1629 = vst.msk [vmem:[%s3492_s3 + $0xc0] sm:$0xff] %vm1604_vm2, %v1406_v56  ;;  %v1421_v57 = vadd.f32 %v2262_v58, %v3167_v25 }
 0x2a2   :  { %v1415_v21 = vpop.f32.mrf.mxu0 }
 0x2a3   :  { %1632 = vst.msk [vmem:[%s3492_s3 + $0xd8] sm:$0xff] %vm1604_vm2, %v1421_v57  ;;  %v1416_v35 = vadd.f32 %v1415_v21, %v3167_v25 }
 0x2a4   :  { %v2265_v60 = vpop.f32.mrf.mxu0 }
 0x2a5   :  { %1631 = vst.msk [vmem:[%s3492_s3 + $0xd0] sm:$0xff] %vm1604_vm2, %v1416_v35  ;;  %v1431_v4 = vadd.f32 %v2265_v60, %v3167_v25 }
 0x2a6   :  { %v1425_v61 = vpop.f32.mrf.mxu0 }
 0x2a7   :  { %1634 = vst.msk [vmem:[%s3492_s3 + $0xe8] sm:$0xff] %vm1604_vm2, %v1431_v4  ;;  %v1426_v0 = vadd.f32 %v1425_v61, %v3167_v25 }
 0x2a8   :  { %v2268_v54 = vpop.f32.mrf.mxu0 }
 0x2a9   :  { %1633 = vst.msk [vmem:[%s3492_s3 + $0xe0] sm:$0xff] %vm1604_vm2, %v1426_v0  ;;  %v1441_v59 = vadd.f32 %v2268_v54, %v3167_v25 }
 0x2aa   :  { %v1435_v1 = vpop.f32.mrf.mxu0 }
 0x2ab   :  { %1636 = vst.msk [vmem:[%s3492_s3 + $0xf8] sm:$0xff] %vm1604_vm2, %v1441_v59  ;;  %v1436_v2 = vadd.f32 %v1435_v1, %v3167_v25 }
 0x2ac   :  { %v2271_v20 = vpop.f32.mrf.mxu0 }
 0x2ad   :  { %1635 = vst.msk [vmem:[%s3492_s3 + $0xf0] sm:$0xff] %vm1604_vm2, %v1436_v2  ;;  %v1451_v3 = vadd.f32 %v2271_v20, %v3167_v25 }
 0x2ae   :  { %v1445_v5 = vpop.f32.mrf.mxu0 }
 0x2af   :  { %1638 = vst.msk [vmem:[%s3492_s3 + $0x108] sm:$0xff] %vm1604_vm2, %v1451_v3  ;;  %v1446_v45 = vadd.f32 %v1445_v5, %v3167_v25 }
 0x2b0   :  { %v2274_v18 = vpop.f32.mrf.mxu0 }
 0x2b1   :  { %1637 = vst.msk [vmem:[%s3492_s3 + $0x100] sm:$0xff] %vm1604_vm2, %v1446_v45  ;;  %v1461_v6 = vadd.f32 %v2274_v18, %v3167_v25 }
 0x2b2   :  { %v1455_v7 = vpop.f32.mrf.mxu0 }
 0x2b3   :  { %1640 = vst.msk [vmem:[%s3492_s3 + $0x118] sm:$0xff] %vm1604_vm2, %v1461_v6  ;;  %v1456_v8 = vadd.f32 %v1455_v7, %v3167_v25 }
 0x2b4   :  { %v2277_v9 = vpop.f32.mrf.mxu0 }
 0x2b5   :  { %1639 = vst.msk [vmem:[%s3492_s3 + $0x110] sm:$0xff] %vm1604_vm2, %v1456_v8  ;;  %v1471_v10 = vadd.f32 %v2277_v9, %v3167_v25 }
 0x2b6   :  { %v1465_v11 = vpop.f32.mrf.mxu0 }
 0x2b7   :  { %1642 = vst.msk [vmem:[%s3492_s3 + $0x128] sm:$0xff] %vm1604_vm2, %v1471_v10  ;;  %v1466_v62 = vadd.f32 %v1465_v11, %v3167_v25 }
 0x2b8   :  { %v2280_v12 = vpop.f32.mrf.mxu0 }
 0x2b9   :  { %1641 = vst.msk [vmem:[%s3492_s3 + $0x120] sm:$0xff] %vm1604_vm2, %v1466_v62  ;;  %v1481_v14 = vadd.f32 %v2280_v12, %v3167_v25 }
 0x2ba   :  { %v1475_v16 = vpop.f32.mrf.mxu0 }
 0x2bb   :  { %1644 = vst.msk [vmem:[%s3492_s3 + $0x138] sm:$0xff] %vm1604_vm2, %v1481_v14  ;;  %v1476_v17 = vadd.f32 %v1475_v16, %v3167_v25 }
 0x2bc   :  { %v2283_v19 = vpop.f32.mrf.mxu0 }
 0x2bd   :  { %1643 = vst.msk [vmem:[%s3492_s3 + $0x130] sm:$0xff] %vm1604_vm2, %v1476_v17  ;;  %v1491_v22 = vadd.f32 %v2283_v19, %v3167_v25 }
 0x2be   :  { %v1485_v15 = vpop.f32.mrf.mxu0 }
 0x2bf   :  { %1646 = vst.msk [vmem:[%s3492_s3 + $0x148] sm:$0xff] %vm1604_vm2, %v1491_v22  ;;  %v1486_v23 = vadd.f32 %v1485_v15, %v3167_v25 }
 0x2c0   :  { %v2286_v24 = vpop.f32.mrf.mxu0 }
 0x2c1   :  { %1645 = vst.msk [vmem:[%s3492_s3 + $0x140] sm:$0xff] %vm1604_vm2, %v1486_v23  ;;  %v1501_v26 = vadd.f32 %v2286_v24, %v3167_v25 }
 0x2c2   :  { %v1495_v27 = vpop.f32.mrf.mxu0 }
 0x2c3   :  { %1648 = vst.msk [vmem:[%s3492_s3 + $0x158] sm:$0xff] %vm1604_vm2, %v1501_v26  ;;  %v1496_v28 = vadd.f32 %v1495_v27, %v3167_v25 }
 0x2c4   :  { %v2289_v29 = vpop.f32.mrf.mxu0 }
 0x2c5   :  { %1647 = vst.msk [vmem:[%s3492_s3 + $0x150] sm:$0xff] %vm1604_vm2, %v1496_v28  ;;  %v1511_v30 = vadd.f32 %v2289_v29, %v3167_v25 }
 0x2c6   :  { %v1505_v31 = vpop.f32.mrf.mxu0 }
 0x2c7   :  { %1650 = vst.msk [vmem:[%s3492_s3 + $0x168] sm:$0xff] %vm1604_vm2, %v1511_v30  ;;  %v1506_v36 = vadd.f32 %v1505_v31, %v3167_v25 }
 0x2c8   :  { %v2292_v32 = vpop.f32.mrf.mxu0 }
 0x2c9   :  { %1649 = vst.msk [vmem:[%s3492_s3 + $0x160] sm:$0xff] %vm1604_vm2, %v1506_v36  ;;  %v1521_v34 = vadd.f32 %v2292_v32, %v3167_v25 }
 0x2ca   :  { %v1515_v37 = vpop.f32.mrf.mxu0 }
 0x2cb   :  { %1652 = vst.msk [vmem:[%s3492_s3 + $0x178] sm:$0xff] %vm1604_vm2, %v1521_v34  ;;  %v1516_v38 = vadd.f32 %v1515_v37, %v3167_v25 }
 0x2cc   :  { %v2295_v40 = vpop.f32.mrf.mxu0 }
 0x2cd   :  { %1651 = vst.msk [vmem:[%s3492_s3 + $0x170] sm:$0xff] %vm1604_vm2, %v1516_v38  ;;  %v1531_v42 = vadd.f32 %v2295_v40, %v3167_v25 }
 0x2ce   :  { %v1525_v41 = vpop.f32.mrf.mxu0 }
 0x2cf   :  { %1654 = vst.msk [vmem:[%s3492_s3 + $0x188] sm:$0xff] %vm1604_vm2, %v1531_v42  ;;  %v1526_v33 = vadd.f32 %v1525_v41, %v3167_v25 }
 0x2d0   :  { %v2298_v43 = vpop.f32.mrf.mxu0 }
 0x2d1   :  { %1653 = vst.msk [vmem:[%s3492_s3 + $0x180] sm:$0xff] %vm1604_vm2, %v1526_v33  ;;  %v1541_v44 = vadd.f32 %v2298_v43, %v3167_v25 }
 0x2d2   :  { %v1535_v53 = vpop.f32.mrf.mxu0 }
 0x2d3   :  { %1656 = vst.msk [vmem:[%s3492_s3 + $0x198] sm:$0xff] %vm1604_vm2, %v1541_v44  ;;  %v1536_v46 = vadd.f32 %v1535_v53, %v3167_v25 }
 0x2d4   :  { %v2301_v39 = vpop.f32.mrf.mxu0 }
 0x2d5   :  { %1655 = vst.msk [vmem:[%s3492_s3 + $0x190] sm:$0xff] %vm1604_vm2, %v1536_v46  ;;  %v1551_v47 = vadd.f32 %v2301_v39, %v3167_v25 }
 0x2d6   :  { %v1545_v49 = vpop.f32.mrf.mxu0 }
 0x2d7   :  { %1658 = vst.msk [vmem:[%s3492_s3 + $0x1a8] sm:$0xff] %vm1604_vm2, %v1551_v47  ;;  %v1546_v63 = vadd.f32 %v1545_v49, %v3167_v25 }
 0x2d8   :  { %v2304_v50 = vpop.f32.mrf.mxu0 }
 0x2d9   :  { %1657 = vst.msk [vmem:[%s3492_s3 + $0x1a0] sm:$0xff] %vm1604_vm2, %v1546_v63  ;;  %v1561_v51 = vadd.f32 %v2304_v50, %v3167_v25 }
 0x2da   :  { %v1555_v48 = vpop.f32.mrf.mxu0 }
 0x2db   :  { %1660 = vst.msk [vmem:[%s3492_s3 + $0x1b8] sm:$0xff] %vm1604_vm2, %v1561_v51  ;;  %v1556_v52 = vadd.f32 %v1555_v48, %v3167_v25 }
 0x2dc   :  { %v2307_v55 = vpop.f32.mrf.mxu0 }
 0x2dd   :  { %1659 = vst.msk [vmem:[%s3492_s3 + $0x1b0] sm:$0xff] %vm1604_vm2, %v1556_v52  ;;  %v1571_v13 = vadd.f32 %v2307_v55, %v3167_v25 }
 0x2de   :  { %v1565_v56 = vpop.f32.mrf.mxu0 }
 0x2df   :  { %1662 = vst.msk [vmem:[%s3492_s3 + $0x1c8] sm:$0xff] %vm1604_vm2, %v1571_v13  ;;  %v1566_v58 = vadd.f32 %v1565_v56, %v3167_v25 }
 0x2e0   :  { %v2310_v57 = vpop.f32.mrf.mxu0 }
 0x2e1   :  { %1661 = vst.msk [vmem:[%s3492_s3 + $0x1c0] sm:$0xff] %vm1604_vm2, %v1566_v58  ;;  %v1581_v21 = vadd.f32 %v2310_v57, %v3167_v25 }
 0x2e2   :  { %v1575_v35 = vpop.f32.mrf.mxu0 }
 0x2e3   :  { %1664 = vst.msk [vmem:[%s3492_s3 + $0x1d8] sm:$0xff] %vm1604_vm2, %v1581_v21  ;;  %v1576_v60 = vadd.f32 %v1575_v35, %v3167_v25 }
 0x2e4   :  { %v2313_v4 = vpop.f32.mrf.mxu0 }
 0x2e5   :  { %1663 = vst.msk [vmem:[%s3492_s3 + $0x1d0] sm:$0xff] %vm1604_vm2, %v1576_v60  ;;  %v1591_v61 = vadd.f32 %v2313_v4, %v3167_v25 }
 0x2e6   :  { %v1585_v0 = vpop.f32.mrf.mxu0 }
 0x2e7   :  { %1666 = vst.msk [vmem:[%s3492_s3 + $0x1e8] sm:$0xff] %vm1604_vm2, %v1591_v61  ;;  %v1586_v54 = vadd.f32 %v1585_v0, %v3167_v25 }
 0x2e8   :  { %v2316_v59 = vpop.f32.mrf.mxu0 }
 0x2e9   :  { %1665 = vst.msk [vmem:[%s3492_s3 + $0x1e0] sm:$0xff] %vm1604_vm2, %v1586_v54  ;;  %v1601_v1 = vadd.f32 %v2316_v59, %v3167_v25 }
 0x2ea   :  { %v1595_v2 = vpop.f32.mrf.mxu0 }
 0x2eb   :  { %1668 = vst.msk [vmem:[%s3492_s3 + $0x1f8] sm:$0xff] %vm1604_vm2, %v1601_v1  ;;  %v1596_v20 = vadd.f32 %v1595_v2, %v3167_v25 }
 0x2ed   :  { %1667 = vst.msk [vmem:[%s3492_s3 + $0x1f0] sm:$0xff] %vm1604_vm2, %v1596_v20 }

</bundles_post_ra>
